<compile_context>
chip_gen: v7x
topology: tpu7x:2x2x1
jax: 0.10.0
libtpu: 0.0.40
codegen_flags: <defaults>
</compile_context>

<pallas_src>
import jax
import jax.numpy as jnp
from jax.experimental import pallas as pl
from jax.experimental.pallas import tpu as pltpu


def attention_pooling_kernel(tokens_ref, mask_ref, w1_ref, b1_ref, w2_ref, out_ref):
    # tokens_ref: (TB, T, D)   mask_ref: (TB, T, 1)
    # w1_ref: (D, U)  b1_ref: (1, U)  w2_ref: (U, NC)
    # out_ref: (TB, NC*D)
    TB, T, D = tokens_ref.shape
    NC = w2_ref.shape[1]

    xf = tokens_ref[...].astype(jnp.float32)           # (TB, T, D)
    x2 = xf.reshape(TB * T, D)                          # T % 8 == 0 -> aligned fold

    # linear1 + tanh (MXU matmul with f32 accumulate, tanh on the EUP).
    a = jnp.tanh(
        jnp.dot(x2, w1_ref[...].astype(jnp.float32),
                preferred_element_type=jnp.float32)
        + b1_ref[...].astype(jnp.float32)
    )                                                   # (TB*T, U) f32

    # linear2 (no bias) -> per-token scores for each context vector.
    # NOTE: on v7x this N=5 matmul wastes MXU pushes; a VPU/XLU reduction of
    # `a` against the 5 w2 columns would free ~2/3 of them.  Kept on the MXU
    # here for simplicity/robustness.
    scores = jnp.dot(a, w2_ref[...].astype(jnp.float32),
                     preferred_element_type=jnp.float32)  # (TB*T, NC)
    scores = scores.reshape(TB, T, NC)                    # aligned fold (T % 8 == 0)

    m = mask_ref[...].astype(jnp.float32)               # (TB, T, 1)

    # Fused masked softmax over T (AllenNLP memory_efficient=False semantics),
    # kept in (TB, T, NC) layout (no transpose into a 5-lane-sparse tile).
    v = scores * m
    e = jnp.exp(v - jnp.max(v, axis=1, keepdims=True))  # shift-invariant
    em = e * m
    se = jnp.sum(e, axis=1, keepdims=True)               # (TB, 1, NC)
    sem = jnp.sum(em, axis=1, keepdims=True)              # (TB, 1, NC)
    # Exact reciprocal: fully-masked (padded) rows give 0/(0 + 1e-13*T) = 0.
    p = em * pl.reciprocal(sem + 1e-13 * se)             # (TB, T, NC)

    # Weighted sum of tokens, contracting T:
    #   out[b, n*D + d] = sum_t p[b, t, n] * x[b, t, d]
    # NC is tiny and static; a VPU multiply + sublane reduce per context vector
    # is cheap.  Build the full lane-dense (TB, NC*D) slab and issue ONE store.
    parts = [jnp.sum(p[:, :, n:n + 1] * xf, axis=1) for n in range(NC)]  # NC x (TB, D)
    out_ref[...] = jnp.concatenate(parts, axis=-1).astype(out_ref.dtype)


def _round_up(x, m):
    return ((x + m - 1) // m) * m


def _vmem_physical_bytes():
    """Physical per-core VMEM; conservative (v7x-sized) fallback if unknown."""
    try:
        v = int(pltpu.get_tpu_info().vmem_capacity_bytes)
        if v > 0:
            return v
    except Exception:
        pass
    return 64 << 20


def attention_pooling(tokens, mask, w1, b1, w2, *, tb=None):
    """tokens: (B, T, D); mask: (B, T); w1: (D, U); b1: (U,); w2: (U, NC)."""
    B, T, D = tokens.shape
    U = w1.shape[1]
    NC = w2.shape[1]

    # --- pad T to a sublane multiple so in-kernel folds are tile aligned.
    # Padded positions carry mask = 0 and contribute exact zeros.
    t_pad = _round_up(T, 8)
    if t_pad != T:
        tokens = jnp.pad(tokens, ((0, 0), (0, t_pad - T), (0, 0)))
        mask = jnp.pad(mask, ((0, 0), (0, t_pad - T)))

    itemsize = tokens.dtype.itemsize

    # --- per-batch-row VMEM cost (bytes): lane/sublane padded tiles, pipeline
    # buffers double counted, f32 intermediates included.
    d_lanes = _round_up(D, 128)
    u_lanes = _round_up(U, 128)
    nc_lanes = _round_up(NC, 128)
    out_lanes = _round_up(NC * D, 128)
    per_row_bytes = (
        2 * t_pad * d_lanes * itemsize        # tokens tile (double-buffered)
        + 2 * t_pad * 128 * 4                 # (tb, T, 1) mask tile, lane-padded (x2 bufs)
        + t_pad * d_lanes * 4                 # tokens in f32
        + t_pad * u_lanes * 4                 # tanh(x @ W1 + b1)
        + 3 * t_pad * nc_lanes * 4            # scores / exp / masked exp
        + (NC + 1) * d_lanes * 4              # per-context sums + output slab
        + 2 * out_lanes * 4                   # output tile (double-buffered)
    )

    vmem_phys = _vmem_physical_bytes()
    live_budget = vmem_phys // 2              # leave headroom for compiler scratch
    vmem_limit = min((vmem_phys * 3) // 4, 128 << 20)   # 48 MiB v7x / 96 MiB v5e-v6e

    if tb is None:
        # Big enough to amortize the ~0.35 us/step pipeline overhead:
        # target >= ~2 MiB of tokens per pipeline buffer.
        tb_amortize = pl.cdiv(2 << 20, max(1, t_pad * D * itemsize))
        tb_vmem = max(8, (live_budget // max(1, per_row_bytes)) // 8 * 8)
        tb = max(8, min(tb_amortize, tb_vmem))
        if B >= 16:
            # Keep >= 2 grid steps so both TensorCores get work on 2-TC chips.
            tb = min(tb, _round_up(pl.cdiv(B, 2), 8))
        tb = min(tb, _round_up(B, 8))
    tb = max(8, _round_up(tb, 8))             # (8,128) rule for the 2-D output block

    # Pad the batch to a multiple of tb.  Padded rows are fully masked and
    # produce exact zeros (no NaNs: fused masked softmax gives 0/(1e-13*T)=0).
    num_tiles = pl.cdiv(B, tb)
    b_pad = num_tiles * tb
    if b_pad != B:
        tokens = jnp.pad(tokens, ((0, b_pad - B), (0, 0), (0, 0)))
        mask = jnp.pad(mask, ((0, b_pad - B), (0, 0)))

    mask3 = mask.reshape(b_pad, t_pad, 1)   # trailing 1 -> free lane broadcast in-kernel
    b1_2d = b1.reshape(1, U)

    cost = pl.CostEstimate(
        flops=2 * b_pad * t_pad * (D * U + U * NC + NC * D),
        transcendentals=b_pad * t_pad * (U + NC),
        # Weights have constant index_maps -> fetched once, not per grid step.
        bytes_accessed=(tokens.size + mask3.size + b_pad * NC * D) * itemsize
        + (w1.size + b1.size + w2.size) * w1.dtype.itemsize,
    )

    out = pl.pallas_call(
        attention_pooling_kernel,
        out_shape=jax.ShapeDtypeStruct((b_pad, NC * D), tokens.dtype),
        grid_spec=pltpu.PrefetchScalarGridSpec(
            num_scalar_prefetch=0,
            grid=(num_tiles,),
            in_specs=[
                pl.BlockSpec((tb, t_pad, D), lambda b: (b, 0, 0)),   # tokens
                pl.BlockSpec((tb, t_pad, 1), lambda b: (b, 0, 0)),   # mask
                pl.BlockSpec((D, U), lambda b: (0, 0)),              # W1 (D, U)
                pl.BlockSpec((1, U), lambda b: (0, 0)),              # b1
                pl.BlockSpec((U, NC), lambda b: (0, 0)),             # W2 (U, NC)
            ],
            out_specs=pl.BlockSpec((tb, NC * D), lambda b: (b, 0)),
        ),
        compiler_params=pltpu.CompilerParams(
            dimension_semantics=("parallel",),
            vmem_limit_bytes=int(vmem_limit),
        ),
        cost_estimate=cost,
    )(tokens, mask3, w1, b1_2d, w2)

    return out[:B]   # already flat: (B, NC*D) == s.view(B, -1)


def reference(tokens, mask, w1, b1, w2):
    a = jnp.tanh(jnp.einsum("btd,du->btu", tokens, w1) + b1)
    a = jnp.einsum("btu,un->btn", a, w2)
    a = jnp.swapaxes(a, 1, 2)                                # (B, NC, T)
    m = mask[:, None, :]
    r = jax.nn.softmax(a * m, axis=-1)
    r = r * m
    r = r / (jnp.sum(r, axis=-1, keepdims=True) + 1e-13)
    # HIGHEST so the reference bmm matches the kernel's exact-f32 contraction.
    s = jnp.einsum("bnt,btd->bnd", r, tokens,
                   precision=jax.lax.Precision.HIGHEST)
    return s.reshape(tokens.shape[0], -1)


if __name__ == "__main__":
    B, T, D = 2, 8, 32            # batch, seq, in_features
    U, NC = 200, 5                # dimension_context_vector_u, number_context_vectors

    key = jax.random.PRNGKey(0)
    k1, k2, k3, k4 = jax.random.split(key, 4)

    tokens = jax.random.normal(k1, (B, T, D), dtype=jnp.float32)
    # mask: first batch fully valid, second batch has last 3 tokens masked out
    mask = jnp.ones((B, T), dtype=jnp.float32)
    mask = mask.at[1, T - 3:].set(0.0)

    # Deterministic parameter init (shapes follow nn.Linear, stored transposed).
    bound1 = 1.0 / (D ** 0.5)
    w1 = jax.random.uniform(k2, (D, U), minval=-bound1, maxval=bound1, dtype=jnp.float32)
    b1 = jax.random.uniform(k3, (U,), minval=-bound1, maxval=bound1, dtype=jnp.float32)
    bound2 = 1.0 / (U ** 0.5)
    w2 = jax.random.uniform(k4, (U, NC), minval=-bound2, maxval=bound2, dtype=jnp.float32)

    out = attention_pooling(tokens, mask, w1, b1, w2)
    out = jax.block_until_ready(out)

    ref = reference(tokens, mask, w1, b1, w2)
    assert out.shape == (B, NC * D)
    # Tolerance covers MXU-pass vs exact-f32 accumulation differences.
    assert jnp.allclose(out, ref, atol=5e-4, rtol=5e-4), "mismatch vs reference"

    print("KERNEL_OK")
</pallas_src>

<mosaic_0001>
module attributes {stable_mosaic.version = 11 : i64} {
  func.func @attention_pooling_kernel(%arg0: i32, %arg1: memref<8x8x32xf32, #tpu.memory_space<vmem>>, %arg2: memref<8x8x1xf32, #tpu.memory_space<vmem>>, %arg3: memref<32x200xf32, #tpu.memory_space<vmem>>, %arg4: memref<1x200xf32, #tpu.memory_space<vmem>>, %arg5: memref<200x5xf32, #tpu.memory_space<vmem>>, %arg6: memref<8x160xf32, #tpu.memory_space<vmem>>) attributes {dimension_semantics = [#tpu.dimension_semantics<parallel>], iteration_bounds = array<i64: 1>, scalar_prefetch = 0 : i64, scratch_operands = 0 : i64, tpu.core_type = #tpu.core_type<tc>, window_params = [{transform_indices = @transform_0, window_bounds = array<i64: 8, 8, 32>}, {transform_indices = @transform_1, window_bounds = array<i64: 8, 8, 1>}, {pipeline_mode = #tpu.pipeline_mode<synchronous>, transform_indices = @transform_2, window_bounds = array<i64: 32, 200>}, {pipeline_mode = #tpu.pipeline_mode<synchronous>, transform_indices = @transform_3, window_bounds = array<i64: 1, 200>}, {pipeline_mode = #tpu.pipeline_mode<synchronous>, transform_indices = @transform_4, window_bounds = array<i64: 200, 5>}, {transform_indices = @transform_5, window_bounds = array<i64: 8, 160>}]} {
    %c0 = arith.constant 0 : index
    %c0_0 = arith.constant 0 : index
    %c0_1 = arith.constant 0 : index
    %0 = vector.load %arg1[%c0, %c0_0, %c0_1] : memref<8x8x32xf32, #tpu.memory_space<vmem>>, vector<8x8x32xf32>
    %1 = vector.shape_cast %0 : vector<8x8x32xf32> to vector<64x32xf32>
    %c0_2 = arith.constant 0 : index
    %c0_3 = arith.constant 0 : index
    %2 = vector.load %arg3[%c0_2, %c0_3] : memref<32x200xf32, #tpu.memory_space<vmem>>, vector<32x200xf32>
    %cst = arith.constant dense<0.000000e+00> : vector<64x200xf32>
    %3 = tpu.matmul %1, %2, %cst {dimension_numbers = #tpu.dot_dimension_numbers<[1], [0], [0], [1], [0, 0, 1, 1], [], []>} : vector<64x32xf32>, vector<32x200xf32>, vector<64x200xf32> -> vector<64x200xf32>
    %c0_4 = arith.constant 0 : index
    %c0_5 = arith.constant 0 : index
    %4 = vector.load %arg4[%c0_4, %c0_5] : memref<1x200xf32, #tpu.memory_space<vmem>>, vector<1x200xf32>
    %5 = vector.broadcast %4 : vector<1x200xf32> to vector<64x200xf32>
    %6 = arith.addf %3, %5 : vector<64x200xf32>
    %7 = math.tanh %6 : vector<64x200xf32>
    %c0_6 = arith.constant 0 : index
    %c0_7 = arith.constant 0 : index
    %8 = vector.load %arg5[%c0_6, %c0_7] : memref<200x5xf32, #tpu.memory_space<vmem>>, vector<200x5xf32>
    %cst_8 = arith.constant dense<0.000000e+00> : vector<64x5xf32>
    %9 = tpu.matmul %7, %8, %cst_8 {dimension_numbers = #tpu.dot_dimension_numbers<[1], [0], [0], [1], [0, 0, 1, 1], [], []>} : vector<64x200xf32>, vector<200x5xf32>, vector<64x5xf32> -> vector<64x5xf32>
    %10 = vector.shape_cast %9 : vector<64x5xf32> to vector<8x8x5xf32>
    %c0_9 = arith.constant 0 : index
    %c0_10 = arith.constant 0 : index
    %c0_11 = arith.constant 0 : index
    %11 = vector.load %arg2[%c0_9, %c0_10, %c0_11] : memref<8x8x1xf32, #tpu.memory_space<vmem>>, vector<8x8x1xf32>
    %12 = vector.broadcast %11 : vector<8x8x1xf32> to vector<8x8x5xf32>
    %13 = arith.mulf %10, %12 : vector<8x8x5xf32>
    %cst_12 = arith.constant dense<0xFF800000> : vector<8x5xf32>
    %14 = vector.multi_reduction <maximumf>, %13, %cst_12 [1] : vector<8x8x5xf32> to vector<8x5xf32>
    %15 = vector.shape_cast %14 : vector<8x5xf32> to vector<8x1x5xf32>
    %16 = vector.broadcast %15 : vector<8x1x5xf32> to vector<8x8x5xf32>
    %17 = arith.subf %13, %16 : vector<8x8x5xf32>
    %18 = math.exp %17 : vector<8x8x5xf32>
    %19 = vector.broadcast %11 : vector<8x8x1xf32> to vector<8x8x5xf32>
    %20 = arith.mulf %18, %19 : vector<8x8x5xf32>
    %cst_13 = arith.constant dense<0.000000e+00> : vector<8x5xf32>
    %21 = vector.multi_reduction <add>, %18, %cst_13 [1] : vector<8x8x5xf32> to vector<8x5xf32>
    %22 = vector.shape_cast %21 : vector<8x5xf32> to vector<8x1x5xf32>
    %cst_14 = arith.constant dense<0.000000e+00> : vector<8x5xf32>
    %23 = vector.multi_reduction <add>, %20, %cst_14 [1] : vector<8x8x5xf32> to vector<8x5xf32>
    %24 = vector.shape_cast %23 : vector<8x5xf32> to vector<8x1x5xf32>
    %cst_15 = arith.constant 9.99999982E-14 : f32
    %25 = vector.broadcast %cst_15 : f32 to vector<8x1x5xf32>
    %26 = arith.mulf %25, %22 : vector<8x1x5xf32>
    %27 = arith.addf %24, %26 : vector<8x1x5xf32>
    %28 = tpu.reciprocal %27 : vector<8x1x5xf32> -> vector<8x1x5xf32>
    %29 = vector.broadcast %28 : vector<8x1x5xf32> to vector<8x8x5xf32>
    %30 = arith.mulf %20, %29 : vector<8x8x5xf32>
    %31 = vector.extract_strided_slice %30 {offsets = [0, 0, 0], sizes = [8, 8, 1], strides = [1, 1, 1]} : vector<8x8x5xf32> to vector<8x8x1xf32>
    %32 = vector.broadcast %31 : vector<8x8x1xf32> to vector<8x8x32xf32>
    %33 = arith.mulf %32, %0 : vector<8x8x32xf32>
    %cst_16 = arith.constant dense<0.000000e+00> : vector<8x32xf32>
    %34 = vector.multi_reduction <add>, %33, %cst_16 [1] : vector<8x8x32xf32> to vector<8x32xf32>
    %35 = vector.extract_strided_slice %30 {offsets = [0, 0, 1], sizes = [8, 8, 1], strides = [1, 1, 1]} : vector<8x8x5xf32> to vector<8x8x1xf32>
    %36 = vector.broadcast %35 : vector<8x8x1xf32> to vector<8x8x32xf32>
    %37 = arith.mulf %36, %0 : vector<8x8x32xf32>
    %cst_17 = arith.constant dense<0.000000e+00> : vector<8x32xf32>
    %38 = vector.multi_reduction <add>, %37, %cst_17 [1] : vector<8x8x32xf32> to vector<8x32xf32>
    %39 = vector.extract_strided_slice %30 {offsets = [0, 0, 2], sizes = [8, 8, 1], strides = [1, 1, 1]} : vector<8x8x5xf32> to vector<8x8x1xf32>
    %40 = vector.broadcast %39 : vector<8x8x1xf32> to vector<8x8x32xf32>
    %41 = arith.mulf %40, %0 : vector<8x8x32xf32>
    %cst_18 = arith.constant dense<0.000000e+00> : vector<8x32xf32>
    %42 = vector.multi_reduction <add>, %41, %cst_18 [1] : vector<8x8x32xf32> to vector<8x32xf32>
    %43 = vector.extract_strided_slice %30 {offsets = [0, 0, 3], sizes = [8, 8, 1], strides = [1, 1, 1]} : vector<8x8x5xf32> to vector<8x8x1xf32>
    %44 = vector.broadcast %43 : vector<8x8x1xf32> to vector<8x8x32xf32>
    %45 = arith.mulf %44, %0 : vector<8x8x32xf32>
    %cst_19 = arith.constant dense<0.000000e+00> : vector<8x32xf32>
    %46 = vector.multi_reduction <add>, %45, %cst_19 [1] : vector<8x8x32xf32> to vector<8x32xf32>
    %47 = vector.extract_strided_slice %30 {offsets = [0, 0, 4], sizes = [8, 8, 1], strides = [1, 1, 1]} : vector<8x8x5xf32> to vector<8x8x1xf32>
    %48 = vector.broadcast %47 : vector<8x8x1xf32> to vector<8x8x32xf32>
    %49 = arith.mulf %48, %0 : vector<8x8x32xf32>
    %cst_20 = arith.constant dense<0.000000e+00> : vector<8x32xf32>
    %50 = vector.multi_reduction <add>, %49, %cst_20 [1] : vector<8x8x32xf32> to vector<8x32xf32>
    %51 = tpu.concatenate %34, %38, %42, %46, %50 in 1 : vector<8x32xf32>, vector<8x32xf32>, vector<8x32xf32>, vector<8x32xf32>, vector<8x32xf32> -> vector<8x160xf32>
    %c0_21 = arith.constant 0 : index
    %c0_22 = arith.constant 0 : index
    %52 = vector.load %arg6[%c0_21, %c0_22] : memref<8x160xf32, #tpu.memory_space<vmem>>, vector<8x160xf32>
    tpu.vector_store %arg6[%c0_21, %c0_22], %51 {strides = array<i32>} : memref<8x160xf32, #tpu.memory_space<vmem>>, vector<8x160xf32>,
    return
  }
  func.func @transform_0(%arg0: i32) -> (i32, i32, i32) {
    %c0_i32 = arith.constant 0 : i32
    %c0_i32_0 = arith.constant 0 : i32
    %c0_i32_1 = arith.constant 0 : i32
    return %arg0, %c0_i32, %c0_i32_0 : i32, i32, i32
  }
  func.func @transform_1(%arg0: i32) -> (i32, i32, i32) {
    %c0_i32 = arith.constant 0 : i32
    %c0_i32_0 = arith.constant 0 : i32
    %c0_i32_1 = arith.constant 0 : i32
    return %arg0, %c0_i32, %c0_i32_0 : i32, i32, i32
  }
  func.func @transform_2(%arg0: i32) -> (i32, i32) {
    %c0_i32 = arith.constant 0 : i32
    %c0_i32_0 = arith.constant 0 : i32
    %c0_i32_1 = arith.constant 0 : i32
    return %c0_i32, %c0_i32_0 : i32, i32
  }
  func.func @transform_3(%arg0: i32) -> (i32, i32) {
    %c0_i32 = arith.constant 0 : i32
    %c0_i32_0 = arith.constant 0 : i32
    %c0_i32_1 = arith.constant 0 : i32
    return %c0_i32, %c0_i32_0 : i32, i32
  }
  func.func @transform_4(%arg0: i32) -> (i32, i32) {
    %c0_i32 = arith.constant 0 : i32
    %c0_i32_0 = arith.constant 0 : i32
    %c0_i32_1 = arith.constant 0 : i32
    return %c0_i32, %c0_i32_0 : i32, i32
  }
  func.func @transform_5(%arg0: i32) -> (i32, i32) {
    %c0_i32 = arith.constant 0 : i32
    %c0_i32_0 = arith.constant 0 : i32
    return %arg0, %c0_i32 : i32, i32
  }
}

</mosaic_0001>

<bundles_post_ra>
// kernel: tpu_custom_call.1
= control target key start
LH: loop header
LB: loop body
LE: loop exit
PB: predicated region body
PF: predicated region fallthrough
CT: control target
= control target key end

     0   :  { %v1472_v7 = vmov 0.0   ;;  %v1473_v8 = vmov 0.0|0.0   ;;  %vm49_vm0 = vcmask 261120   ;;  %s2097_s0 = inlined_call_operand.vmem [shape: f32[8,8,32], index: 0, kind: input, shape index: {}]   ;;  %s2098_s1 = inlined_call_operand.vmem [shape: f32[8,8,1], index: 1, kind: input, shape index: {}]   ;;  %s2099_s2 = inlined_call_operand.vmem [shape: f32[32,200], index: 2, kind: input, shape index: {}]   ;;  %s2100_s3 = inlined_call_operand.vmem [shape: f32[1,200], index: 3, kind: input, shape index: {}]   ;;  %s2101_s4 = inlined_call_operand.vmem [shape: f32[200,5], index: 4, kind: input, shape index: {}]   ;;  %s2102_s5 = inlined_call_operand.hbm [shape: f32[8,160], index: 5, kind: output, shape index: {}]  }
   0x1   :  { %v30_v0 = vld [vmem:[%s2099_s2 + $0x8] sm:$0xff]  ;;  %v32_v1 = vld [vmem:[%s2099_s2 + $0x18] sm:$0xff]  ;;  %v29_v2 = vld [vmem:[%s2099_s2] sm:$0xff]  ;;  %138 = vmatprep.mubr.f32.mxu0 %v1472_v7  ;;  %1309 = vmatprep.subr.bf16.mxu1 %v1473_v8 }
   0x2   :  { %v1265_v3 = vpack.c.bf16 %v32_v1, %v30_v0  ;;  %v31_v4 = vld [vmem:[%s2099_s2 + $0x10] sm:$0xff]  ;;  %v34_v5 = vld [vmem:[%s2099_s2 + $0x28] sm:$0xff]  ;;  %v36_v6 = vld [vmem:[%s2099_s2 + $0x38] sm:$0xff] }
   0x3   :  { %v1267_v9 = vpack.c.bf16 %v31_v4, %v29_v2  ;;  %v1269_v10 = vpack.c.bf16 %v36_v6, %v34_v5  ;;  %v33_v11 = vld [vmem:[%s2099_s2 + $0x20] sm:$0xff]  ;;  %v35_v12 = vld [vmem:[%s2099_s2 + $0x30] sm:$0xff]  ;;  %v204_v15 = vld [vmem:[%s2101_s4 + $0x8] sm:$0xff] }
   0x4   :  { %1266 = vmatprep.subr.bf16.mxu0 %v1265_v3  ;;  %v1271_v13 = vpack.c.bf16 %v35_v12, %v33_v11  ;;  %v203_v14 = vld [vmem:[%s2101_s4] sm:$0xff]  ;;  %v205_v18 = vld [vmem:[%s2101_s4 + $0x10] sm:$0xff]  ;;  %v206_v19 = vld [vmem:[%s2101_s4 + $0x18] sm:$0xff] }
   0x5   :  { %1268 = vmatpush1.bf16.msra.mxu0 %v1267_v9  ;;  %v1274_v16 = vpack.c.bf16 %v204_v15, %v203_v14  ;;  %v21_v17 = vld [vmem:[%s2097_s0] sm:$0xff]  ;;  %v1277_v20 = vpack.c.bf16 %v206_v19, %v205_v18 }
   0x6   :  { %1270 = vmatprep.subr.bf16.mxu0 %v1269_v10 }
   0x7   :  { %1322 = vmatpush1.bf16.msra.mxu1 %v1274_v16 }
   0x8   :  { %1310 = vmatprep.subr.bf16.mxu1 %v1473_v8 }
   0x9   :  { %1272 = vmatpush1.bf16.msra.mxu0 %v1271_v13 }
   0xa   :  { %1273 = vmatprep.subr.bf16.mxu0 %v1473_v8 }
   0xc   :  { %1249 = vmatmul.mubr.msk.f32.vlgmr.msra.gmra.mrb[0].mxu0 %vm49_vm0, %v21_v17 }
   0xd   :  { %10 = vsyncpa [#allocation3], 0  ;;  %144 = vmatprep.mubr.f32.mxu0 %v1472_v7  ;;  %v22_v21 = vld [vmem:[%s2097_s0 + $0x8] sm:$0xff]  ;;  %1275 = vmatpush1.bf16.msra.mxu0 %v1274_v16  ;;  %v207_v22 = vld [vmem:[%s2101_s4 + $0x20] sm:$0xff]  ;;  %v1474_v60 = vmov 0   ;;  %v39_v4 = vlaneseq  ;;  %vm228_vm1 = vcmask 588800  }
   0xe   :  { %v208_v23 = vld [vmem:[%s2101_s4 + $0x28] sm:$0xff]  ;;  %1276 = vmatprep.subr.bf16.mxu0 %v1473_v8  ;;  %1323 = vmatpush1.bf16.msra.mxu1 %v1277_v20  ;;  %v23_v25 = vld [vmem:[%s2097_s0 + $0x10] sm:$0xff]  ;;  %v210_v27 = vld [vmem:[%s2101_s4 + $0x38] sm:$0xff]  ;;  %vm414_vm2 = vcmask 39936   ;;  %vm1143_vm3 = vcmask 1041409   ;;  %vm1145_vm4 = vcmask 1042434  }
   0xf   :  { %1311 = vmatprep.subr.bf16.mxu1 %v1473_v8  ;;  %v1280_v24 = vpack.c.bf16 %v208_v23, %v207_v22  ;;  %v209_v26 = vld [vmem:[%s2101_s4 + $0x30] sm:$0xff]  ;;  %v24_v29 = vld [vmem:[%s2097_s0 + $0x18] sm:$0xff]  ;;  %v211_v30 = vld [vmem:[%s2101_s4 + $0x40] sm:$0xff]  ;;  %1346 = vset.pattern.permute.xlu0 %v1474_v60  ;;  %v40_v5 = vshrl.u32 %v39_v4, 7  ;;  %vm1147_vm5 = vcmask 1043459   ;;  %vm1149_vm6 = vcmask 1044484  }
  0x10   :  { %1250 = vmatmul.mubr.msk.f32.gmra.mrb[2].mxu0 %vm49_vm0, %v22_v21  ;;  %v1283_v28 = vpack.c.bf16 %v210_v27, %v209_v26  ;;  %v212_v31 = vld [vmem:[%s2101_s4 + $0x48] sm:$0xff]  ;;  %v25_v33 = vld [vmem:[%s2097_s0 + $0x20] sm:$0xff]  ;;  %v213_v34 = vld [vmem:[%s2101_s4 + $0x50] sm:$0xff]  ;;  %1347 = vset.pattern.permute.xlu1 %v1474_v60  ;;  %vm1153_vm7 = vcmask 1046534   ;;  %vm1151_vm8 = vcmask 1045509   ;;  %vm1155_vm9 = vcmask 1047559  }
  0x11   :  { %150 = vmatprep.mubr.f32.mxu0 %v1472_v7  ;;  %1278 = vmatpush1.bf16.msra.mxu0 %v1277_v20  ;;  %v1286_v32 = vpack.c.bf16 %v212_v31, %v211_v30  ;;  %v214_v35 = vld [vmem:[%s2101_s4 + $0x58] sm:$0xff]  ;;  %v26_v37 = vld [vmem:[%s2097_s0 + $0x28] sm:$0xff]  ;;  %v215_v38 = vld [vmem:[%s2101_s4 + $0x60] sm:$0xff]  ;;  %v41_v6 = vsub.s32 0, %v40_v5  ;;  %s1480_s27 = smov 64   ;;  %vm1229_vm10 = vcmask 523264  }
  0x12   :  { %1279 = vmatprep.subr.bf16.mxu0 %v1473_v8  ;;  %1324 = vmatpush1.bf16.msra.mxu1 %v1280_v24  ;;  %v1289_v36 = vpack.c.bf16 %v214_v35, %v213_v34  ;;  %v216_v39 = vld [vmem:[%s2101_s4 + $0x68] sm:$0xff]  ;;  %v27_v41 = vld [vmem:[%s2097_s0 + $0x30] sm:$0xff]  ;;  %v218_v43 = vld [vmem:[%s2101_s4 + $0x78] sm:$0xff]  ;;  %s1482_s28 = smov [#allocation2]   ;;  %vm1231_vm11 = vcmask 785408  }
  0x13   :  { %1312 = vmatprep.subr.bf16.mxu1 %v1473_v8  ;;  %v1292_v40 = vpack.c.bf16 %v216_v39, %v215_v38  ;;  %v217_v42 = vld [vmem:[%s2101_s4 + $0x70] sm:$0xff]  ;;  %v28_v45 = vld [vmem:[%s2097_s0 + $0x38] sm:$0xff]  ;;  %v219_v46 = vld [vmem:[%s2101_s4 + $0x80] sm:$0xff]  ;;  %s1241_s29 = sshll.u32 %s1482_s28, 4  ;;  %s1242_s29 = int_to_ptr.vmem [resolvable:$true] %s1241_s29 }
  0x14   :  { %1251 = vmatmul.mubr.msk.f32.gmra.mrb[4].mxu0 %vm49_vm0, %v23_v25  ;;  %v1295_v44 = vpack.c.bf16 %v218_v43, %v217_v42  ;;  %v220_v47 = vld [vmem:[%s2101_s4 + $0x88] sm:$0xff]  ;;  %v221_v49 = vld [vmem:[%s2101_s4 + $0x90] sm:$0xff]  ;;  %v222_v50 = vld [vmem:[%s2101_s4 + $0x98] sm:$0xff]  ;;  %s1448_s30 = scalar_lea.vmem %s1242_s29, 256  ;;  %p1453_p1 = scmp.lt.s32.totalorder %s1242_s29, %s1242_s29 }
  0x15   :  { %156 = vmatprep.mubr.f32.mxu0 %v1472_v7  ;;  %1281 = vmatpush1.bf16.msra.mxu0 %v1280_v24  ;;  %v1298_v48 = vpack.c.bf16 %v220_v47, %v219_v46  ;;  %v1301_v51 = vpack.c.bf16 %v222_v50, %v221_v49  ;;  %v223_v52 = vld [vmem:[%s2101_s4 + $0xa0] sm:$0xff]  ;;  %v224_v53 = vld [vmem:[%s2101_s4 + $0xa8] sm:$0xff]  ;;  %v225_v55 = vld [vmem:[%s2101_s4 + $0xb0] sm:$0xff]  ;;  %p1449_p0 = scmp.ne.s32.totalorder %s1242_s29, %s1448_s30  ;;  %p1454_p2 = scmp.lt.s32.totalorder %s1448_s30, %s1448_s30 }
  0x16   :  { %1282 = vmatprep.subr.bf16.mxu0 %v1473_v8  ;;  %1325 = vmatpush1.bf16.msra.mxu1 %v1283_v28  ;;  %v1304_v54 = vpack.c.bf16 %v224_v53, %v223_v52  ;;  %v226_v56 = vld [vmem:[%s2101_s4 + $0xb8] sm:$0xff]  ;;  %v227_v58 = vld [vmem:[%s2101_s4 + $0xc0] sm:$0xff]  ;;  %v360_v61 = vld [vmem:[%s2098_s1 + $0x10] sm:$0xff]  ;;  %s1481_s4 = smov 96  }
  0x17   :  { %1313 = vmatprep.subr.bf16.mxu1 %v1473_v8  ;;  %v1307_v57 = vpack.c.bf16 %v226_v56, %v225_v55  ;;  %v358_v59 = vld [vmem:[%s2098_s1] sm:$0xff]  ;;  %378 = vperm.xlu1 %1347, %v360_v61   ;;  %v359_v62 = vld [vmem:[%s2098_s1 + $0x8] sm:$0xff]  ;;  %v361_v63 = vld [vmem:[%s2098_s1 + $0x18] sm:$0xff]  ;;  %v1476_v61 = vmov 3   ;;  %p1455_p3 = por %p1454_p2, %p1453_p1 }
  0x18   :  { %1252 = vmatmul.mubr.msk.f32.gmra.mrb[6].mxu0 %vm49_vm0, %v24_v29  ;;  %368 = vperm.xlu0 %1346, %v358_v59   ;;  %v362_v0 = vld [vmem:[%s2098_s1 + $0x20] sm:$0xff]  ;;  %v363_v1 = vld [vmem:[%s2098_s1 + $0x28] sm:$0xff]  ;;  %v364_v2 = vld [vmem:[%s2098_s1 + $0x30] sm:$0xff]  ;;  %v1475_v59 = vmov 1  }
  0x19   :  { %162 = vmatprep.mubr.f32.mxu0 %v1472_v7  ;;  %1284 = vmatpush1.bf16.msra.mxu0 %v1283_v28  ;;  %v365_v3 = vld [vmem:[%s2098_s1 + $0x38] sm:$0xff]  ;;  %p1456_p4 = pnand %p1455_p3, %p1449_p0 }
  0x1a   :  { %1285 = vmatprep.subr.bf16.mxu0 %v1473_v8  ;;  %1326 = vmatpush1.bf16.msra.mxu1 %v1286_v32 }
  0x1b   :  { %1314 = vmatprep.subr.bf16.mxu1 %v1473_v8  ;;  %383 = vperm.xlu1 %1347, %v361_v63  }
  0x1c   :  { %1253 = vmatmul.mubr.msk.f32.gmra.mrb[8].mxu0 %vm49_vm0, %v25_v33  ;;  %373 = vperm.xlu0 %1346, %v359_v62  }
  0x1d   :  { %168 = vmatprep.mubr.f32.mxu0 %v1472_v7  ;;  %1287 = vmatpush1.bf16.msra.mxu0 %v1286_v32 }
  0x1e   :  { %1288 = vmatprep.subr.bf16.mxu0 %v1473_v8  ;;  %1327 = vmatpush1.bf16.msra.mxu1 %v1289_v36 }
  0x1f   :  { %1315 = vmatprep.subr.bf16.mxu1 %v1473_v8  ;;  %393 = vperm.xlu1 %1347, %v363_v1  }
  0x20   :  { %1254 = vmatmul.mubr.msk.f32.gmra.mrb[10].mxu0 %vm49_vm0, %v26_v37  ;;  %388 = vperm.xlu0 %1346, %v362_v0  }
  0x21   :  { %174 = vmatprep.mubr.f32.mxu0 %v1472_v7  ;;  %1290 = vmatpush1.bf16.msra.mxu0 %v1289_v36 }
  0x22   :  { %1291 = vmatprep.subr.bf16.mxu0 %v1473_v8  ;;  %1328 = vmatpush1.bf16.msra.mxu1 %v1292_v40 }
  0x23   :  { %1316 = vmatprep.subr.bf16.mxu1 %v1473_v8  ;;  %403 = vperm.xlu1 %1347, %v365_v3  }
  0x24   :  { %1255 = vmatmul.mubr.msk.f32.gmra.mrb[12].mxu0 %vm49_vm0, %v27_v41  ;;  %398 = vperm.xlu0 %1346, %v364_v2  }
  0x25   :  { %180 = vmatprep.mubr.f32.mxu0 %v1472_v7  ;;  %1293 = vmatpush1.bf16.msra.mxu0 %v1292_v40 }
  0x26   :  { %1294 = vmatprep.subr.bf16.mxu0 %v1473_v8  ;;  %1329 = vmatpush1.bf16.msra.mxu1 %v1295_v44 }
  0x27   :  { %1317 = vmatprep.subr.bf16.mxu1 %v1473_v8  ;;  %1348 = vset.pattern.permute.xlu1 %v1475_v59 }
  0x28   :  { %1256 = vmatmul.mubr.msk.f32.gmra.mrb[14].mxu0 %vm49_vm0, %v28_v45  ;;  %1350 = vset.pattern.permute.xlu0 %v1476_v61 }
  0x29   :  { %1296 = vmatpush1.bf16.msra.mxu0 %v1295_v44 }
  0x2a   :  { %1297 = vmatprep.subr.bf16.mxu0 %v1473_v8  ;;  %1330 = vmatpush1.bf16.msra.mxu1 %v1298_v48 }
  0x2b   :  { %1318 = vmatprep.subr.bf16.mxu1 %v1473_v8 }
  0x2d   :  { %1299 = vmatpush1.bf16.msra.mxu0 %v1298_v48 }
  0x2e   :  { %1300 = vmatprep.subr.bf16.mxu0 %v1473_v8  ;;  %1331 = vmatpush1.bf16.msra.mxu1 %v1301_v51 }
  0x2f   :  { %1319 = vmatprep.subr.bf16.mxu1 %v1473_v8 }
  0x31   :  { %1302 = vmatpush1.bf16.msra.mxu0 %v1301_v51 }
  0x32   :  { %1303 = vmatprep.subr.bf16.mxu0 %v1473_v8  ;;  %1332 = vmatpush1.bf16.msra.mxu1 %v1304_v54 }
  0x33   :  { %1320 = vmatprep.subr.bf16.mxu1 %v1473_v8 }
  0x35   :  { %1305 = vmatpush1.bf16.msra.mxu0 %v1304_v54 }
  0x36   :  { %1306 = vmatprep.subr.bf16.mxu0 %v1473_v8  ;;  %1333 = vmatpush1.bf16.msra.mxu1 %v1307_v57  ;;  %v45_v8 = vsub.s32 1, %v40_v5 }
  0x37   :  { %1321 = vmatprep.subr.mxu1 %v1472_v7 }
  0x39   :  { %1308 = vmatpush1.bf16.msra.mxu0 %v1307_v57 }
  0x3a   :  { %301 = vmatprep.subr.mxu0 %v1472_v7  ;;  %1334 = vmatpush1.msra.mxu1 %v227_v58  ;;  %v37_v7 = vld [vmem:[%s2100_s3] sm:$0x3] }
  0x3b   :  { %v1707_v9 = vrot.slane %v37_v7, %v41_v6  ;;  %v1709_v10 = vrot.slane %v37_v7, %v45_v8 }
  0x3d   :  { %302 = vmatpush1.msra.mxu0 %v227_v58 }
  0x96   :  { %v1743_v6 = vpop.permute.xlu1 %378 }
  0x97   :  { %v1737_v62 = vpop.permute.xlu0 %368 }
  0x9b   :  { %v1740_v2 = vpop.permute.xlu0 %373 }
  0xdf   :  { %v140_v11 = vpop.f32.mrb[0].mxu0 }
  0xe0   :  { %v141_v12 = vadd.f32 %v140_v11, %v1707_v9  ;;  %v142_v13 = vpop.f32.mrb[1].mxu0 }
  0xe1   :  { %v143_v14 = vadd.f32 %v142_v13, %v1709_v10 }
  0xe3   :  { %1376 = vtanh.f32 %v143_v14  ;;  %v146_v15 = vpop.f32.mrb[2].mxu0 }
  0xe4   :  { %1378 = vtanh.f32 %v141_v12  ;;  %v147_v16 = vadd.f32 %v146_v15, %v1707_v9  ;;  %v148_v17 = vpop.f32.mrb[3].mxu0 }
  0xe5   :  { %v149_v18 = vadd.f32 %v148_v17, %v1709_v10 }
  0xe6   :  { %1380 = vtanh.f32 %v147_v16 }
  0xe7   :  { %1382 = vtanh.f32 %v149_v18  ;;  %v152_v19 = vpop.f32.mrb[4].mxu0  ;;  %v1748_v18 = vpop.permute.xlu1 %383 }
  0xe8   :  { %v153_v20 = vadd.f32 %v152_v19, %v1707_v9  ;;  %v154_v21 = vpop.f32.mrb[5].mxu0 }
  0xe9   :  { %v155_v22 = vadd.f32 %v154_v21, %v1709_v10 }
  0xea   :  { %1384 = vtanh.f32 %v153_v20 }
  0xeb   :  { %1386 = vtanh.f32 %v155_v22  ;;  %v158_v23 = vpop.f32.mrb[6].mxu0 }
  0xec   :  { %v159_v24 = vadd.f32 %v158_v23, %v1707_v9  ;;  %v160_v25 = vpop.f32.mrb[7].mxu0 }
  0xed   :  { %v1377_v26 = vpop.eup %1376  ;;  %v161_v27 = vadd.f32 %v160_v25, %v1709_v10 }
  0xee   :  { %v1379_v28 = vpop.eup %1378  ;;  %1388 = vtanh.f32 %v159_v24  ;;  %1257 = vmatprep.mubr.msk.f32.mxu0 %vm228_vm1, %v1377_v26 }
  0xef   :  { %1390 = vtanh.f32 %v161_v27  ;;  %v164_v29 = vpop.f32.mrb[8].mxu0  ;;  %318 = vmatmul.mubr.f32.vlgmr.msra.gmra.mrb[16].mxu0 %v1379_v28 }
  0xf0   :  { %v1381_v30 = vpop.eup %1380  ;;  %v165_v31 = vadd.f32 %v164_v29, %v1707_v9  ;;  %v166_v32 = vpop.f32.mrb[9].mxu0 }
  0xf1   :  { %v1383_v33 = vpop.eup %1382  ;;  %v167_v34 = vadd.f32 %v166_v32, %v1709_v10 }
  0xf2   :  { %1392 = vtanh.f32 %v165_v31  ;;  %1258 = vmatprep.mubr.msk.f32.mxu0 %vm228_vm1, %v1383_v33 }
  0xf3   :  { %1394 = vtanh.f32 %v167_v34  ;;  %v170_v35 = vpop.f32.mrb[10].mxu0  ;;  %323 = vmatmul.mubr.f32.gmra.mrb[18].mxu0 %v1381_v30  ;;  %v1753_v30 = vpop.permute.xlu0 %388 }
  0xf4   :  { %v1385_v36 = vpop.eup %1384  ;;  %v171_v37 = vadd.f32 %v170_v35, %v1707_v9  ;;  %v172_v38 = vpop.f32.mrb[11].mxu0 }
  0xf5   :  { %v1387_v39 = vpop.eup %1386  ;;  %v173_v40 = vadd.f32 %v172_v38, %v1709_v10 }
  0xf6   :  { %1396 = vtanh.f32 %v171_v37  ;;  %1259 = vmatprep.mubr.msk.f32.mxu0 %vm228_vm1, %v1387_v39 }
  0xf7   :  { %1398 = vtanh.f32 %v173_v40  ;;  %v176_v41 = vpop.f32.mrb[12].mxu0  ;;  %328 = vmatmul.mubr.f32.gmra.mrb[20].mxu0 %v1385_v36 }
  0xf8   :  { %v1389_v42 = vpop.eup %1388  ;;  %v177_v43 = vadd.f32 %v176_v41, %v1707_v9  ;;  %v178_v44 = vpop.f32.mrb[13].mxu0 }
  0xf9   :  { %v1391_v45 = vpop.eup %1390  ;;  %v179_v46 = vadd.f32 %v178_v44, %v1709_v10 }
  0xfa   :  { %1400 = vtanh.f32 %v177_v43  ;;  %1260 = vmatprep.mubr.msk.f32.mxu1 %vm228_vm1, %v1391_v45 }
  0xfb   :  { %1402 = vtanh.f32 %v179_v46  ;;  %v182_v47 = vpop.f32.mrb[14].mxu0  ;;  %333 = vmatmul.mubr.f32.vlgmr.msra.gmra.mrb[0].mxu1 %v1389_v42  ;;  %v1760_v46 = vpop.permute.xlu1 %393 }
  0xfc   :  { %v1393_v48 = vpop.eup %1392  ;;  %v183_v49 = vadd.f32 %v182_v47, %v1707_v9  ;;  %v184_v50 = vpop.f32.mrb[15].mxu0 }
  0xfd   :  { %v1395_v51 = vpop.eup %1394  ;;  %v185_v52 = vadd.f32 %v184_v50, %v1709_v10 }
  0xfe   :  { %1404 = vtanh.f32 %v183_v49  ;;  %1261 = vmatprep.mubr.msk.f32.mxu1 %vm228_vm1, %v1395_v51 }
  0xff   :  { %1406 = vtanh.f32 %v185_v52  ;;  %338 = vmatmul.mubr.f32.gmra.mrb[2].mxu1 %v1393_v48 }
 0x100   :  { %v1397_v53 = vpop.eup %1396 }
 0x101   :  { %v1399_v54 = vpop.eup %1398 }
 0x102   :  { %1262 = vmatprep.mubr.msk.f32.mxu1 %vm228_vm1, %v1399_v54 }
 0x103   :  { %343 = vmatmul.mubr.f32.gmra.mrb[4].mxu1 %v1397_v53 }
 0x104   :  { %v1401_v55 = vpop.eup %1400 }
 0x105   :  { %v1403_v56 = vpop.eup %1402 }
 0x106   :  { %1263 = vmatprep.mubr.msk.f32.mxu1 %vm228_vm1, %v1403_v56  ;;  %v1767_v56 = vpop.permute.xlu0 %398 }
 0x107   :  { %348 = vmatmul.mubr.f32.gmra.mrb[6].mxu1 %v1401_v55 }
 0x108   :  { %v1405_v57 = vpop.eup %1404 }
 0x109   :  { %v1407_v58 = vpop.eup %1406 }
 0x10a   :  { %1264 = vmatprep.mubr.msk.f32.mxu1 %vm228_vm1, %v1407_v58 }
 0x10b   :  { %353 = vmatmul.mubr.f32.gmra.mrb[8].mxu1 %v1405_v57 }
 0x1c2   :  { %v319_v63 = vpop.f32.mrb[16].mxu0 }
 0x1c3   :  { %v406_v0 = vmul.f32 %v1737_v62, %v319_v63  ;;  %v321_v1 = vpop.f32.mrb[17].mxu0 }
 0x1c5   :  { %v415_v3 = vsel %vm414_vm2, %v406_v0, -inf }
 0x1c6   :  { %v416_v4 = vrot.slane %v415_v3, 4  ;;  %v324_v5 = vpop.f32.mrb[18].mxu0 }
 0x1c7   :  { %v407_v7 = vmul.f32 %v1740_v2, %v324_v5  ;;  %v326_v8 = vpop.f32.mrb[19].mxu0 }
 0x1c8   :  { %v417_v9 = vmax.f32 %v415_v3, %v416_v4 }
 0x1c9   :  { %v422_v10 = vsel %vm414_vm2, %v407_v7, -inf }
 0x1ca   :  { %v418_v11 = vrot.slane %v417_v9, 2  ;;  %v423_v12 = vrot.slane %v422_v10, 4  ;;  %v329_v13 = vpop.f32.mrb[20].mxu0 }
 0x1cb   :  { %v408_v14 = vmul.f32 %v1743_v6, %v329_v13  ;;  %v331_v15 = vpop.f32.mrb[21].mxu0 }
 0x1cc   :  { %v419_v16 = vmax.f32 %v417_v9, %v418_v11  ;;  %v424_v17 = vmax.f32 %v422_v10, %v423_v12  ;;  %v1774_v12 = vpop.permute.xlu1 %403 }
 0x1cd   :  { %v429_v19 = vsel %vm414_vm2, %v408_v14, -inf }
 0x1ce   :  { %v420_v20 = vrot.slane %v419_v16, 1  ;;  %v425_v21 = vrot.slane %v424_v17, 2  ;;  %v430_v22 = vrot.slane %v429_v19, 4  ;;  %v334_v23 = vpop.f32.mrb[0].mxu1 }
 0x1cf   :  { %v409_v24 = vmul.f32 %v1748_v18, %v334_v23  ;;  %v336_v25 = vpop.f32.mrb[1].mxu1 }
 0x1d0   :  { %v421_v26 = vmax.f32 %v419_v16, %v420_v20  ;;  %v426_v27 = vmax.f32 %v424_v17, %v425_v21  ;;  %v431_v28 = vmax.f32 %v429_v19, %v430_v22 }
 0x1d1   :  { %v436_v29 = vsel %vm414_vm2, %v409_v24, -inf }
 0x1d2   :  { %v471_v31 = vsub.f32 %v406_v0, %v421_v26  ;;  %v427_v32 = vrot.slane %v426_v27, 1  ;;  %v432_v33 = vrot.slane %v431_v28, 2  ;;  %v437_v34 = vrot.slane %v436_v29, 4  ;;  %v339_v35 = vpop.f32.mrb[2].mxu1 }
 0x1d3   :  { %v1756_v36 = vmul.f32 %v1753_v30, %v339_v35  ;;  %v341_v37 = vpop.f32.mrb[3].mxu1 }
 0x1d4   :  { %v479_v38 = vmul.f32 1.442695, %v471_v31  ;;  %v428_v39 = vmax.f32 %v426_v27, %v427_v32  ;;  %v433_v40 = vmax.f32 %v431_v28, %v432_v33  ;;  %v438_v41 = vmax.f32 %v436_v29, %v437_v34 }
 0x1d5   :  { %v443_v42 = vsel %vm414_vm2, %v1756_v36, -inf }
 0x1d6   :  { %1408 = vpow2.f32 %v479_v38  ;;  %v472_v43 = vsub.f32 %v407_v7, %v428_v39  ;;  %v434_v44 = vrot.slane %v433_v40, 1  ;;  %v439_v45 = vrot.slane %v438_v41, 2  ;;  %v344_v47 = vpop.f32.mrb[4].mxu1 }
 0x1d7   :  { %v444_v48 = vrot.slane %v443_v42, 4  ;;  %v1763_v49 = vmul.f32 %v1760_v46, %v344_v47  ;;  %v346_v50 = vpop.f32.mrb[5].mxu1 }
 0x1d8   :  { %v481_v51 = vmul.f32 1.442695, %v472_v43  ;;  %v435_v52 = vmax.f32 %v433_v40, %v434_v44  ;;  %v440_v53 = vmax.f32 %v438_v41, %v439_v45 }
 0x1d9   :  { %v445_v54 = vmax.f32 %v443_v42, %v444_v48  ;;  %v450_v55 = vsel %vm414_vm2, %v1763_v49, -inf }
 0x1da   :  { %1410 = vpow2.f32 %v481_v51  ;;  %v473_v57 = vsub.f32 %v408_v14, %v435_v52  ;;  %v441_v58 = vrot.slane %v440_v53, 1  ;;  %v451_v63 = vrot.slane %v450_v55, 4  ;;  %v349_v0 = vpop.f32.mrb[6].mxu1 }
 0x1db   :  { %v446_v1 = vrot.slane %v445_v54, 2  ;;  %v1770_v3 = vmul.f32 %v1767_v56, %v349_v0  ;;  %v351_v4 = vpop.f32.mrb[7].mxu1 }
 0x1dc   :  { %v483_v5 = vmul.f32 1.442695, %v473_v57  ;;  %v442_v7 = vmax.f32 %v440_v53, %v441_v58  ;;  %v452_v8 = vmax.f32 %v450_v55, %v451_v63 }
 0x1dd   :  { %v447_v9 = vmax.f32 %v445_v54, %v446_v1  ;;  %v457_v10 = vsel %vm414_vm2, %v1770_v3, -inf }
 0x1de   :  { %1412 = vpow2.f32 %v483_v5  ;;  %v474_v11 = vsub.f32 %v409_v24, %v442_v7  ;;  %v453_v13 = vrot.slane %v452_v8, 2  ;;  %v458_v14 = vrot.slane %v457_v10, 4  ;;  %v354_v15 = vpop.f32.mrb[8].mxu1 }
 0x1df   :  { %v448_v16 = vrot.slane %v447_v9, 1  ;;  %v1777_v17 = vmul.f32 %v1774_v12, %v354_v15  ;;  %v356_v19 = vpop.f32.mrb[9].mxu1 }
 0x1e0   :  { %v1409_v20 = vpop.eup %1408  ;;  %v485_v21 = vmul.f32 1.442695, %v474_v11  ;;  %v454_v22 = vmax.f32 %v452_v8, %v453_v13  ;;  %v459_v23 = vmax.f32 %v457_v10, %v458_v14 }
 0x1e1   :  { %v503_v25 = vsel %vm414_vm2, %v1409_v20, 0.0  ;;  %v449_v26 = vmax.f32 %v447_v9, %v448_v16  ;;  %v464_v24 = vsel %vm414_vm2, %v1777_v17, -inf  ;;  %v1783_v27 = vmul.f32 %v1409_v20, %v1737_v62 }
 0x1e2   :  { %v504_v28 = vrot.slane %v503_v25, 4  ;;  %1414 = vpow2.f32 %v485_v21  ;;  %v455_v29 = vrot.slane %v454_v22, 1  ;;  %v460_v31 = vrot.slane %v459_v23, 2 }
 0x1e3   :  { %v475_v32 = vsub.f32 %v1756_v36, %v449_v26  ;;  %v465_v33 = vrot.slane %v464_v24, 4  ;;  %v559_v34 = vsel %vm414_vm2, %v1783_v27, 0.0 }
 0x1e4   :  { %v1411_v35 = vpop.eup %1410  ;;  %v505_v37 = vadd.f32 %v504_v28, %v503_v25  ;;  %v456_v38 = vmax.f32 %v454_v22, %v455_v29  ;;  %v461_v39 = vmax.f32 %v459_v23, %v460_v31  ;;  %v560_v40 = vrot.slane %v559_v34, 4 }
 0x1e5   :  { %v510_v41 = vsel %vm414_vm2, %v1411_v35, 0.0  ;;  %v487_v42 = vmul.f32 1.442695, %v475_v32  ;;  %v466_v62 = vmax.f32 %v464_v24, %v465_v33  ;;  %v1790_v43 = vmul.f32 %v1411_v35, %v1740_v2 }
 0x1e6   :  { %v506_v44 = vrot.slane %v505_v37, 2  ;;  %v511_v45 = vrot.slane %v510_v41, 4  ;;  %v476_v36 = vsub.f32 %v1763_v49, %v456_v38  ;;  %v462_v47 = vrot.slane %v461_v39, 1 }
 0x1e7   :  { %1416 = vpow2.f32 %v487_v42  ;;  %v467_v48 = vrot.slane %v466_v62, 2  ;;  %v561_v50 = vadd.f32 %v560_v40, %v559_v34  ;;  %v566_v51 = vsel %vm414_vm2, %v1790_v43, 0.0 }
 0x1e8   :  { %v1413_v52 = vpop.eup %1412  ;;  %v507_v53 = vadd.f32 %v506_v44, %v505_v37  ;;  %v512_v54 = vadd.f32 %v511_v45, %v510_v41  ;;  %v489_v55 = vmul.f32 1.442695, %v476_v36  ;;  %v463_v57 = vmax.f32 %v461_v39, %v462_v47 }
 0x1e9   :  { %v517_v58 = vsel %vm414_vm2, %v1413_v52, 0.0  ;;  %v468_v2 = vmax.f32 %v466_v62, %v467_v48  ;;  %v562_v63 = vrot.slane %v561_v50, 2  ;;  %v567_v0 = vrot.slane %v566_v51, 4 }
 0x1ea   :  { %v508_v1 = vrot.slane %v507_v53, 1  ;;  %v513_v4 = vrot.slane %v512_v54, 2  ;;  %v518_v49 = vrot.slane %v517_v58, 4  ;;  %1418 = vpow2.f32 %v489_v55 }
 0x1eb   :  { %v477_v5 = vsub.f32 %v1770_v3, %v463_v57  ;;  %v469_v7 = vrot.slane %v468_v2, 1  ;;  %v563_v8 = vadd.f32 %v562_v63, %v561_v50  ;;  %v568_v9 = vadd.f32 %v567_v0, %v566_v51 }
 0x1ec   :  { %v1415_v10 = vpop.eup %1414  ;;  %v509_v11 = vadd.f32 %v508_v1, %v507_v53  ;;  %v514_v13 = vadd.f32 %v513_v4, %v512_v54  ;;  %v519_v14 = vadd.f32 %v518_v49, %v517_v58  ;;  %v1798_v15 = vmul.f32 %v1413_v52, %v1743_v6 }
 0x1ed   :  { %v524_v16 = vsel %vm414_vm2, %v1415_v10, 0.0  ;;  %v491_v19 = vmul.f32 1.442695, %v477_v5  ;;  %v470_v20 = vmax.f32 %v468_v2, %v469_v7  ;;  %v564_v21 = vrot.slane %v563_v8, 1 }
 0x1ee   :  { %v615_v22 = vmul.f32 1e-13, %v509_v11  ;;  %v515_v23 = vrot.slane %v514_v13, 1  ;;  %v520_v25 = vrot.slane %v519_v14, 2  ;;  %v525_v26 = vrot.slane %v524_v16, 4 }
 0x1ef   :  { %1420 = vpow2.f32 %v491_v19  ;;  %v478_v3 = vsub.f32 %v1777_v17, %v470_v20  ;;  %v565_v24 = vadd.f32 %v564_v21, %v563_v8  ;;  %v569_v28 = vrot.slane %v568_v9, 2 }
 0x1f0   :  { %v516_v29 = vadd.f32 %v515_v23, %v514_v13  ;;  %v521_v31 = vadd.f32 %v520_v25, %v519_v14  ;;  %v526_v32 = vadd.f32 %v525_v26, %v524_v16  ;;  %v1803_v6 = vmul.f32 %v1415_v10, %v1748_v18 }
 0x1f1   :  { %v1417_v33 = vpop.eup %1416  ;;  %v493_v34 = vmul.f32 1.442695, %v478_v3  ;;  %v623_v35 = vadd.f32 %v615_v22, %v565_v24  ;;  %v570_v37 = vadd.f32 %v569_v28, %v568_v9  ;;  %v573_v36 = vsel %vm414_vm2, %v1798_v15, 0.0 }
 0x1f2   :  { %v616_v38 = vmul.f32 1e-13, %v516_v29  ;;  %v522_v39 = vrot.slane %v521_v31, 1  ;;  %v527_v40 = vrot.slane %v526_v32, 2  ;;  %v531_v41 = vsel %vm414_vm2, %v1417_v33, 0.0 }
 0x1f3   :  { %v532_v42 = vrot.slane %v531_v41, 4  ;;  %1422 = vpow2.f32 %v493_v34  ;;  %v571_v17 = vrot.slane %v570_v37, 1  ;;  %v580_v62 = vsel %vm414_vm2, %v1803_v6, 0.0 }
 0x1f4   :  { %v1419_v44 = vpop.eup %1418  ;;  %v528_v45 = vadd.f32 %v527_v40, %v526_v32  ;;  %1424 = vrcp.f32 %v623_v35  ;;  %v581_v18 = vrot.slane %v580_v62, 4  ;;  %v1812_v51 = vmul.f32 %v1417_v33, %v1753_v30 }
 0x1f5   :  { %v533_v47 = vadd.f32 %v532_v42, %v531_v41  ;;  %v538_v48 = vsel %vm414_vm2, %v1419_v44, 0.0  ;;  %v572_v50 = vadd.f32 %v571_v17, %v570_v37  ;;  %v523_v52 = vadd.f32 %v522_v39, %v521_v31 }
 0x1f6   :  { %v529_v53 = vrot.slane %v528_v45, 1  ;;  %v539_v54 = vrot.slane %v538_v48, 4  ;;  %v582_v55 = vadd.f32 %v581_v18, %v580_v62  ;;  %v587_v2 = vsel %vm414_vm2, %v1812_v51, 0.0 }
 0x1f7   :  { %v534_v57 = vrot.slane %v533_v47, 2  ;;  %v624_v58 = vadd.f32 %v616_v38, %v572_v50  ;;  %v574_v63 = vrot.slane %v573_v36, 4  ;;  %v588_v49 = vrot.slane %v587_v2, 4 }
 0x1f8   :  { %v530_v0 = vadd.f32 %v529_v53, %v528_v45  ;;  %v540_v1 = vadd.f32 %v539_v54, %v538_v48  ;;  %v583_v4 = vrot.slane %v582_v55, 2  ;;  %v1817_v30 = vmul.f32 %v1419_v44, %v1760_v46 }
 0x1f9   :  { %v1421_v5 = vpop.eup %1420  ;;  %v535_v7 = vadd.f32 %v534_v57, %v533_v47  ;;  %1426 = vrcp.f32 %v624_v58  ;;  %v575_v8 = vadd.f32 %v574_v63, %v573_v36  ;;  %v589_v19 = vadd.f32 %v588_v49, %v587_v2 }
 0x1fa   :  { %v618_v9 = vmul.f32 1e-13, %v530_v0  ;;  %v541_v10 = vrot.slane %v540_v1, 2  ;;  %v545_v11 = vsel %vm414_vm2, %v1421_v5, 0.0  ;;  %v584_v13 = vadd.f32 %v583_v4, %v582_v55 }
 0x1fb   :  { %v536_v14 = vrot.slane %v535_v7, 1  ;;  %v546_v16 = vrot.slane %v545_v11, 4  ;;  %v576_v20 = vrot.slane %v575_v8, 2  ;;  %v594_v23 = vsel %vm414_vm2, %v1817_v30, 0.0 }
 0x1fc   :  { %v542_v21 = vadd.f32 %v541_v10, %v540_v1  ;;  %v585_v22 = vrot.slane %v584_v13, 1  ;;  %v1823_v25 = vmul.f32 %v1421_v5, %v1767_v56  ;;  %v590_v24 = vrot.slane %v589_v19, 2 }
 0x1fd   :  { %v1423_v26 = vpop.eup %1422  ;;  %v537_v46 = vadd.f32 %v536_v14, %v535_v7  ;;  %v547_v3 = vadd.f32 %v546_v16, %v545_v11  ;;  %v577_v28 = vadd.f32 %v576_v20, %v575_v8  ;;  %v595_v34 = vrot.slane %v594_v23, 4 }
 0x1fe   :  { %v1425_v29 = vpop.eup %1424  ;;  %v543_v31 = vrot.slane %v542_v21, 1  ;;  %v552_v32 = vsel %vm414_vm2, %v1423_v26, 0.0  ;;  %v586_v33 = vadd.f32 %v585_v22, %v584_v13  ;;  %v617_v35 = vmul.f32 1e-13, %v523_v52 }
 0x1ff   :  { %v548_v37 = vrot.slane %v547_v3, 2  ;;  %v553_v38 = vrot.slane %v552_v32, 4  ;;  %v1827_v39 = vmul.f32 %v1425_v29, %v1783_v27  ;;  %v619_v40 = vmul.f32 1e-13, %v537_v46 }
 0x200   :  { %v626_v56 = vadd.f32 %v618_v9, %v586_v33  ;;  %v591_v41 = vadd.f32 %v590_v24, %v589_v19  ;;  %v578_v42 = vrot.slane %v577_v28, 1  ;;  %v596_v44 = vadd.f32 %v595_v34, %v594_v23 }
 0x201   :  { %v549_v17 = vadd.f32 %v548_v37, %v547_v3  ;;  %v554_v62 = vadd.f32 %v553_v38, %v552_v32  ;;  %944 = vperm.xlu0 %1350, %v1827_v39   ;;  %752 = vperm.xlu1 %1348, %v1827_v39   ;;  %v601_v45 = vsel %vm414_vm2, %v1823_v25, 0.0  ;;  %v544_v18 = vadd.f32 %v543_v31, %v542_v21 }
 0x202   :  { %1428 = vrcp.f32 %v626_v56  ;;  %v592_v36 = vrot.slane %v591_v41, 1  ;;  %v579_v47 = vadd.f32 %v578_v42, %v577_v28  ;;  %v597_v52 = vrot.slane %v596_v44, 2 }
 0x203   :  { %v1427_v27 = vpop.eup %1426  ;;  %v550_v48 = vrot.slane %v549_v17, 1  ;;  %v555_v50 = vrot.slane %v554_v62, 2  ;;  %v602_v53 = vrot.slane %v601_v45, 4  ;;  %v1837_v58 = vmul.f32 %v1423_v26, %v1774_v12 }
 0x204   :  { %v1834_v54 = vmul.f32 %v1427_v27, %v1790_v43  ;;  %v593_v55 = vadd.f32 %v592_v36, %v591_v41  ;;  %v625_v57 = vadd.f32 %v617_v35, %v579_v47  ;;  %v1477_v63 = vmov 2  }
 0x205   :  { %v556_v2 = vadd.f32 %v555_v50, %v554_v62  ;;  %1352 = vset.pattern.permute.xlu0 %v1475_v59  ;;  %1349 = vset.pattern.permute.xlu1 %v1477_v63  ;;  %v598_v0 = vadd.f32 %v597_v52, %v596_v44  ;;  %v603_v43 = vadd.f32 %v602_v53, %v601_v45  ;;  %v608_v4 = vsel %vm414_vm2, %v1837_v58, 0.0 }
 0x206   :  { %848 = vperm.xlu1 %1349, %v1827_v39   ;;  %756 = vperm.xlu0 %1352, %v1834_v54   ;;  %v627_v1 = vadd.f32 %v619_v40, %v593_v55  ;;  %1430 = vrcp.f32 %v625_v57  ;;  %v620_v49 = vmul.f32 1e-13, %v544_v18  ;;  %v609_v7 = vrot.slane %v608_v4, 4  ;;  %v1908_v55 = vld [vmem:[%s2097_s0 + $0x18] sm:$0xff] }
 0x207   :  { %v557_v12 = vrot.slane %v556_v2, 1  ;;  %v599_v5 = vrot.slane %v598_v0, 1  ;;  %v551_v8 = vadd.f32 %v550_v48, %v549_v17  ;;  %v604_v9 = vrot.slane %v603_v43, 2 }
 0x208   :  { %1432 = vrcp.f32 %v627_v1  ;;  %v610_v11 = vadd.f32 %v609_v7, %v608_v4 }
 0x209   :  { %v600_v10 = vadd.f32 %v599_v5, %v598_v0  ;;  %v605_v13 = vadd.f32 %v604_v9, %v603_v43  ;;  %v558_v14 = vadd.f32 %v557_v12, %v556_v2  ;;  %v621_v21 = vmul.f32 1e-13, %v551_v8 }
 0x20a   :  { %1351 = vset.pattern.permute.xlu1 %v1474_v60  ;;  %1353 = vset.pattern.permute.xlu0 %v1477_v63  ;;  %v611_v19 = vrot.slane %v610_v11, 2 }
 0x20b   :  { %852 = vperm.xlu0 %1353, %v1834_v54   ;;  %654 = vperm.xlu1 %1351, %v1834_v54   ;;  %v628_v16 = vadd.f32 %v620_v49, %v600_v10  ;;  %v606_v22 = vrot.slane %v605_v13, 1  ;;  %v622_v3 = vmul.f32 1e-13, %v558_v14 }
 0x20c   :  { %v1429_v20 = vpop.eup %1428  ;;  %v612_v26 = vadd.f32 %v611_v19, %v610_v11 }
 0x20d   :  { %v1850_v23 = vmul.f32 %v1429_v20, %v1803_v6  ;;  %1434 = vrcp.f32 %v628_v16  ;;  %v607_v46 = vadd.f32 %v606_v22, %v605_v13 }
 0x20e   :  { %v613_v24 = vrot.slane %v612_v26, 1 }
 0x20f   :  { %860 = vperm.xlu0 %1353, %v1850_v23   ;;  %1354 = vset.pattern.permute.xlu1 %v1476_v61  ;;  %v629_v29 = vadd.f32 %v621_v21, %v607_v46 }
 0x210   :  { %v1431_v28 = vpop.eup %1430  ;;  %948 = vperm.xlu1 %1354, %v1834_v54   ;;  %v614_v31 = vadd.f32 %v613_v24, %v612_v26 }
 0x211   :  { %1436 = vrcp.f32 %v629_v29  ;;  %v641_v6 = vmul.f32 %v1431_v28, %v1798_v15 }
 0x212   :  { %v1433_v32 = vpop.eup %1432  ;;  %v630_v34 = vadd.f32 %v622_v3, %v614_v31  ;;  %v1918_v3 = vld [vmem:[%s2097_s0 + $0x20] sm:$0xff] }
 0x213   :  { %v643_v33 = vmul.f32 %v1433_v32, %v1812_v51 }
 0x214   :  { %1355 = vset.pattern.permute.xlu1 %v1475_v59  ;;  %1438 = vrcp.f32 %v630_v34 }
 0x215   :  { %864 = vperm.xlu0 %1353, %v643_v33   ;;  %760 = vperm.xlu1 %1355, %v641_v6  }
 0x217   :  { %v1435_v35 = vpop.eup %1434 }
 0x218   :  { %v644_v37 = vmul.f32 %v1435_v35, %v1817_v30  ;;  %v1478_v30 = vmov 4  }
 0x219   :  { %1365 = vset.pattern.permute.xlu0 %v1476_v61  ;;  %1356 = vset.pattern.permute.xlu1 %v1477_v63 }
 0x21a   :  { %964 = vperm.xlu0 %1365, %v644_v37   ;;  %856 = vperm.xlu1 %1356, %v641_v6  }
 0x21b   :  { %v1437_v38 = vpop.eup %1436 }
 0x21c   :  { %v645_v51 = vmul.f32 %v1437_v38, %v1823_v25 }
 0x21e   :  { %1366 = vset.pattern.permute.xlu0 %v1475_v59  ;;  %1357 = vset.pattern.permute.xlu1 %v1476_v61  ;;  %v1439_v15 = vpop.eup %1438 }
 0x21f   :  { %776 = vperm.xlu0 %1366, %v645_v51   ;;  %952 = vperm.xlu1 %1357, %v641_v6   ;;  %v646_v40 = vmul.f32 %v1439_v15, %v1837_v58 }
 0x223   :  { %780 = vperm.xlu0 %1366, %v646_v40   ;;  %1358 = vset.pattern.permute.xlu1 %v1474_v60 }
 0x224   :  { %664 = vperm.xlu1 %1358, %v1850_v23  }
 0x227   :  { %1368 = vset.pattern.permute.xlu0 %v1476_v61 }
 0x228   :  { %972 = vperm.xlu0 %1368, %v646_v40   ;;  %1359 = vset.pattern.permute.xlu1 %v1475_v59 }
 0x229   :  { %764 = vperm.xlu1 %1359, %v1850_v23  }
 0x22c   :  { %1369 = vset.pattern.permute.xlu0 %v1474_v60 }
 0x22d   :  { %649 = vperm.xlu0 %1369, %v1827_v39   ;;  %1360 = vset.pattern.permute.xlu1 %v1476_v61 }
 0x22e   :  { %956 = vperm.xlu1 %1360, %v1850_v23  }
 0x231   :  { %659 = vperm.xlu0 %1369, %v641_v6  }
 0x232   :  { %1361 = vset.pattern.permute.xlu1 %v1475_v59 }
 0x233   :  { %768 = vperm.xlu1 %1361, %v643_v33  }
 0x235   :  { %669 = vperm.xlu0 %1369, %v643_v33  }
 0x237   :  { %1362 = vset.pattern.permute.xlu1 %v1476_v61 }
 0x238   :  { %960 = vperm.xlu1 %1362, %v643_v33  }
 0x239   :  { %679 = vperm.xlu0 %1369, %v645_v51  }
 0x23c   :  { %1363 = vset.pattern.permute.xlu1 %v1475_v59 }
 0x23d   :  { %1373 = vset.pattern.permute.xlu0 %v1478_v30  ;;  %772 = vperm.xlu1 %1363, %v644_v37  }
 0x23e   :  { %1044 = vperm.xlu0 %1373, %v1834_v54  }
 0x241   :  { %1364 = vset.pattern.permute.xlu1 %v1477_v63 }
 0x242   :  { %1056 = vperm.xlu0 %1373, %v643_v33   ;;  %868 = vperm.xlu1 %1364, %v644_v37  }
 0x246   :  { %1068 = vperm.xlu0 %1373, %v646_v40   ;;  %872 = vperm.xlu1 %1364, %v645_v51  }
 0x24a   :  { %876 = vperm.xlu1 %1364, %v646_v40  }
 0x24e   :  { %1367 = vset.pattern.permute.xlu1 %v1476_v61 }
 0x24f   :  { %968 = vperm.xlu1 %1367, %v645_v51  }
 0x253   :  { %1370 = vset.pattern.permute.xlu1 %v1478_v30 }
 0x254   :  { %1040 = vperm.xlu1 %1370, %v1827_v39   ;;  %v1887_v39 = vld [vmem:[%s2097_s0] sm:$0xff] }
 0x258   :  { %1371 = vset.pattern.permute.xlu1 %v1474_v60 }
 0x259   :  { %674 = vperm.xlu1 %1371, %v644_v37  }
 0x25d   :  { %1372 = vset.pattern.permute.xlu1 %v1478_v30 }
 0x25e   :  { %1048 = vperm.xlu1 %1372, %v641_v6   ;;  %v1924_v6 = vld [vmem:[%s2097_s0 + $0x10] sm:$0xff] }
 0x262   :  { %1052 = vperm.xlu1 %1372, %v1850_v23  }
 0x266   :  { %1060 = vperm.xlu1 %1372, %v644_v37  }
 0x26a   :  { %1374 = vset.pattern.permute.xlu1 %v1474_v60  ;;  %v1894_v60 = vld [vmem:[%s2097_s0 + $0x8] sm:$0xff] }
 0x26b   :  { %684 = vperm.xlu1 %1374, %v646_v40  }
 0x26f   :  { %1375 = vset.pattern.permute.xlu1 %v1478_v30 }
 0x270   :  { %1064 = vperm.xlu1 %1375, %v645_v51  }
 0x280   :  { %v945_v59 = vpop.permute.xlu0 %944  ;;  %v753_v25 = vpop.permute.xlu1 %752 }
 0x281   :  { %v975_v17 = vmul.f32 %v1887_v39, %v945_v59  ;;  %v783_v44 = vmul.f32 %v1887_v39, %v753_v25 }
 0x283   :  { %v983_v27 = vsel %vm49_vm0, %v975_v17, 0.0  ;;  %v791_v48 = vsel %vm49_vm0, %v783_v44, 0.0 }
 0x284   :  { %v984_v63 = vrot.slane %v983_v27, 4  ;;  %v792_v0 = vrot.slane %v791_v48, 4 }
 0x285   :  { %v849_v61 = vpop.permute.xlu1 %848  ;;  %v757_v56 = vpop.permute.xlu0 %756 }
 0x286   :  { %v784_v45 = vmul.f32 %v1894_v60, %v757_v56  ;;  %v879_v36 = vmul.f32 %v1887_v39, %v849_v61  ;;  %v985_v7 = vadd.f32 %v984_v63, %v983_v27  ;;  %v793_v10 = vadd.f32 %v792_v0, %v791_v48 }
 0x288   :  { %v798_v50 = vsel %vm49_vm0, %v784_v45, 0.0  ;;  %v887_v53 = vsel %vm49_vm0, %v879_v36, 0.0  ;;  %v986_v21 = vrot.slane %v985_v7, 2  ;;  %v794_v23 = vrot.slane %v793_v10, 2 }
 0x289   :  { %v799_v1 = vrot.slane %v798_v50, 4  ;;  %v888_v4 = vrot.slane %v887_v53, 4 }
 0x28a   :  { %v853_v41 = vpop.permute.xlu0 %852  ;;  %v655_v42 = vpop.permute.xlu1 %654  ;;  %v987_v35 = vadd.f32 %v986_v21, %v985_v7  ;;  %v795_v38 = vadd.f32 %v794_v23, %v793_v10 }
 0x28b   :  { %v880_v47 = vmul.f32 %v1894_v60, %v853_v41  ;;  %v688_v52 = vmul.f32 %v1894_v60, %v655_v42  ;;  %v800_v11 = vadd.f32 %v799_v1, %v798_v50  ;;  %v889_v16 = vadd.f32 %v888_v4, %v887_v53 }
 0x28c   :  { %v988_v42 = vrot.slane %v987_v35, 1  ;;  %v796_v27 = vrot.slane %v795_v38, 1 }
 0x28d   :  { %v894_v54 = vsel %vm49_vm0, %v880_v47, 0.0  ;;  %v702_v12 = vsel %vm49_vm0, %v688_v52, 0.0  ;;  %v801_v26 = vrot.slane %v800_v11, 2  ;;  %v890_v31 = vrot.slane %v889_v16, 2 }
 0x28e   :  { %v861_v62 = vpop.permute.xlu0 %860  ;;  %v895_v49 = vrot.slane %v894_v54, 4  ;;  %v703_v13 = vrot.slane %v702_v12, 4 }
 0x28f   :  { %v949_v18 = vpop.permute.xlu1 %948  ;;  %v882_v57 = vmul.f32 %v1908_v55, %v861_v62  ;;  %v802_v51 = vadd.f32 %v801_v26, %v800_v11  ;;  %v891_v59 = vadd.f32 %v890_v31, %v889_v16 }
 0x290   :  { %v976_v43 = vmul.f32 %v1894_v60, %v949_v18  ;;  %v896_v19 = vadd.f32 %v895_v49, %v894_v54  ;;  %v704_v46 = vadd.f32 %v703_v13, %v702_v12  ;;  %v1938_v54 = vld [vmem:[%s2097_s0 + $0x28] sm:$0xff] }
 0x291   :  { %v908_v5 = vsel %vm49_vm0, %v882_v57, 0.0  ;;  %v803_v45 = vrot.slane %v802_v51, 1  ;;  %v892_v48 = vrot.slane %v891_v59, 1 }
 0x292   :  { %v990_v14 = vsel %vm49_vm0, %v976_v43, 0.0  ;;  %v909_v20 = vrot.slane %v908_v5, 4  ;;  %v897_v32 = vrot.slane %v896_v19, 2  ;;  %v705_v15 = vrot.slane %v704_v46, 2 }
 0x293   :  { %v991_v22 = vrot.slane %v990_v14, 4  ;;  %v804_v43 = vadd.f32 %v803_v45, %v802_v51  ;;  %v893_v7 = vadd.f32 %v892_v48, %v891_v59 }
 0x294   :  { %v865_v58 = vpop.permute.xlu0 %864  ;;  %v761_v2 = vpop.permute.xlu1 %760  ;;  %v910_v33 = vadd.f32 %v909_v20, %v908_v5  ;;  %v898_v25 = vadd.f32 %v897_v32, %v896_v19  ;;  %v706_v18 = vadd.f32 %v705_v15, %v704_v46  ;;  %v797_v5 = vadd.f32 %v796_v27, %v795_v38 }
 0x295   :  { %v883_v24 = vmul.f32 %v1918_v3, %v865_v58  ;;  %v785_v34 = vmul.f32 %v1924_v6, %v761_v2  ;;  %v992_v37 = vadd.f32 %v991_v22, %v990_v14  ;;  %v1941_v2 = vadd.f32 %v988_v42, %v987_v35  ;;  %v1977_v42 = vld [vmem:[%s2097_s0 + $0x38] sm:$0xff] }
 0x296   :  { %v911_v61 = vrot.slane %v910_v33, 2  ;;  %v899_v50 = vrot.slane %v898_v25, 1  ;;  %v707_v4 = vrot.slane %v706_v18, 1  ;;  %v1955_v46 = vsel %vm1143_vm3, %v804_v43, %v797_v5 }
 0x297   :  { %v915_v40 = vsel %vm49_vm0, %v883_v24, 0.0  ;;  %v805_v56 = vsel %vm49_vm0, %v785_v34, 0.0  ;;  %v993_v17 = vrot.slane %v992_v37, 2 }
 0x298   :  { %v916_v62 = vrot.slane %v915_v40, 4  ;;  %v806_v36 = vrot.slane %v805_v56, 4  ;;  %v912_v52 = vadd.f32 %v911_v61, %v910_v33  ;;  %v1957_v24 = vadd.f32 %v707_v4, %v706_v18 }
 0x299   :  { %v965_v8 = vpop.permute.xlu0 %964  ;;  %v857_v9 = vpop.permute.xlu1 %856  ;;  %v994_v63 = vadd.f32 %v993_v17, %v992_v37 }
 0x29a   :  { %v881_v44 = vmul.f32 %v1924_v6, %v857_v9  ;;  %v980_v57 = vmul.f32 %v1938_v54, %v965_v8  ;;  %v917_v0 = vadd.f32 %v916_v62, %v915_v40  ;;  %v807_v49 = vadd.f32 %v806_v36, %v805_v56  ;;  %v1949_v8 = vld [vmem:[%s2097_s0 + $0x30] sm:$0xff]  ;;  %s1479_s0 = smov 32  }
 0x29b   :  { %v900_v9 = vadd.f32 %v899_v50, %v898_v25  ;;  %v913_v10 = vrot.slane %v912_v52, 1  ;;  %v995_v20 = vrot.slane %v994_v63, 1 }
 0x29c   :  { %v901_v1 = vsel %vm49_vm0, %v881_v44, 0.0  ;;  %v1018_v11 = vsel %vm49_vm0, %v980_v57, 0.0  ;;  %v918_v21 = vrot.slane %v917_v0, 2  ;;  %v808_v31 = vrot.slane %v807_v49, 2 }
 0x29d   :  { %v902_v13 = vrot.slane %v901_v1, 4  ;;  %v1961_v33 = vsel %vm1143_vm3, %v900_v9, %v893_v7  ;;  %v1019_v34 = vrot.slane %v1018_v11, 4  ;;  %v1968_v59 = vadd.f32 %v995_v20, %v994_v63 }
 0x29e   :  { %v777_v28 = vpop.permute.xlu0 %776  ;;  %v953_v29 = vpop.permute.xlu1 %952  ;;  %v1970_v25 = vadd.f32 %v918_v21, %v917_v0  ;;  %v809_v56 = vadd.f32 %v808_v31, %v807_v49 }
 0x29f   :  { %v789_v14 = vmul.f32 %v1949_v8, %v777_v28  ;;  %v977_v32 = vmul.f32 %v1924_v6, %v953_v29  ;;  %v1963_v28 = vadd.f32 %v913_v10, %v912_v52  ;;  %v903_v37 = vadd.f32 %v902_v13, %v901_v1 }
 0x2a0   :  { %v1983_v27 = vadd.f32 %v1019_v34, %v1018_v11 }
 0x2a1   :  { %v833_v38 = vsel %vm49_vm0, %v789_v14, 0.0  ;;  %v904_v48 = vrot.slane %v903_v37, 2 }
 0x2a2   :  { %v1928_v30 = vpop.permute.xlu0 %780  ;;  %v834_v45 = vrot.slane %v833_v38, 4 }
 0x2a3   :  { %v665_v41 = vpop.permute.xlu1 %664  ;;  %v790_v17 = vmul.f32 %v1977_v42, %v1928_v30 }
 0x2a4   :  { %v690_v47 = vmul.f32 %v1908_v55, %v665_v41  ;;  %v997_v41 = vsel %vm49_vm0, %v977_v32, 0.0  ;;  %v835_v5 = vadd.f32 %v834_v45, %v833_v38 }
 0x2a5   :  { %v840_v1 = vsel %vm49_vm0, %v790_v17, 0.0 }
 0x2a6   :  { %v716_v12 = vsel %vm49_vm0, %v690_v47, 0.0  ;;  %v841_v21 = vrot.slane %v840_v1, 4  ;;  %v836_v38 = vrot.slane %v835_v5, 2 }
 0x2a7   :  { %v1933_v53 = vpop.permute.xlu0 %972  ;;  %v717_v22 = vrot.slane %v716_v12, 4 }
 0x2a8   :  { %v765_v58 = vpop.permute.xlu1 %764 }
 0x2a9   :  { %v786_v16 = vmul.f32 %v1908_v55, %v765_v58  ;;  %v718_v29 = vadd.f32 %v717_v22, %v716_v12  ;;  %v998_v58 = vrot.slane %v997_v41, 4  ;;  %v810_v12 = vrot.slane %v809_v56, 1 }
 0x2ab   :  { %v812_v51 = vsel %vm49_vm0, %v786_v16, 0.0  ;;  %v719_v63 = vrot.slane %v718_v29, 2  ;;  %v999_v20 = vadd.f32 %v998_v58, %v997_v41 }
 0x2ac   :  { %v650_v19 = vpop.permute.xlu0 %649  ;;  %v813_v18 = vrot.slane %v812_v51, 4 }
 0x2ad   :  { %v687_v23 = vmul.f32 %v1887_v39, %v650_v19  ;;  %v957_v26 = vpop.permute.xlu1 %956  ;;  %v905_v19 = vadd.f32 %v904_v48, %v903_v37  ;;  %v720_v22 = vadd.f32 %v719_v63, %v718_v29  ;;  %v837_v48 = vadd.f32 %v836_v38, %v835_v5 }
 0x2ae   :  { %v814_v7 = vadd.f32 %v813_v18, %v812_v51  ;;  %v978_v31 = vmul.f32 %v1908_v55, %v957_v26 }
 0x2af   :  { %v695_v35 = vsel %vm49_vm0, %v687_v23, 0.0  ;;  %v906_v29 = vrot.slane %v905_v19, 1  ;;  %v721_v45 = vrot.slane %v720_v22, 1 }
 0x2b0   :  { %v696_v15 = vrot.slane %v695_v35, 4  ;;  %v660_v40 = vpop.permute.xlu0 %659  ;;  %v815_v51 = vrot.slane %v814_v7, 2  ;;  %v1004_v18 = vsel %vm49_vm0, %v978_v31, 0.0 }
 0x2b1   :  { %v689_v61 = vmul.f32 %v1924_v6, %v660_v40  ;;  %v811_v40 = vadd.f32 %v810_v12, %v809_v56 }
 0x2b2   :  { %v697_v62 = vadd.f32 %v696_v15, %v695_v35  ;;  %v769_v44 = vpop.permute.xlu1 %768  ;;  %v1021_v35 = vrot.slane %v1983_v27, 2 }
 0x2b3   :  { %v709_v36 = vsel %vm49_vm0, %v689_v61, 0.0  ;;  %v787_v47 = vmul.f32 %v1918_v3, %v769_v44  ;;  %v842_v44 = vadd.f32 %v841_v21, %v840_v1  ;;  %v1005_v1 = vrot.slane %v1004_v18, 4 }
 0x2b4   :  { %v698_v50 = vrot.slane %v697_v62, 2  ;;  %v710_v52 = vrot.slane %v709_v36, 4  ;;  %v670_v57 = vpop.permute.xlu0 %669 }
 0x2b5   :  { %v691_v0 = vmul.f32 %v1918_v3, %v670_v57  ;;  %v819_v30 = vsel %vm49_vm0, %v787_v47, 0.0  ;;  %v982_v57 = vmul.f32 %v1977_v42, %v1933_v53 }
 0x2b6   :  { %v699_v43 = vadd.f32 %v698_v50, %v697_v62  ;;  %v711_v4 = vadd.f32 %v710_v52, %v709_v36  ;;  %v820_v49 = vrot.slane %v819_v30, 4  ;;  %v1000_v62 = vrot.slane %v999_v20, 2 }
 0x2b7   :  { %v723_v9 = vsel %vm49_vm0, %v691_v0, 0.0  ;;  %v961_v10 = vpop.permute.xlu1 %960  ;;  %v816_v50 = vadd.f32 %v815_v51, %v814_v7  ;;  %v907_v0 = vadd.f32 %v906_v29, %v905_v19  ;;  %v1032_v53 = vsel %vm49_vm0, %v982_v57, 0.0 }
 0x2b8   :  { %v700_v11 = vrot.slane %v699_v43, 1  ;;  %v712_v13 = vrot.slane %v711_v4, 2  ;;  %v724_v14 = vrot.slane %v723_v9, 4  ;;  %v821_v16 = vadd.f32 %v820_v49, %v819_v30 }
 0x2b9   :  { %v979_v15 = vmul.f32 %v1918_v3, %v961_v10  ;;  %v843_v30 = vrot.slane %v842_v44, 2  ;;  %v722_v49 = vadd.f32 %v721_v45, %v720_v22  ;;  %v2004_v10 = vadd.f32 %v1000_v62, %v999_v20 }
 0x2ba   :  { %v701_v23 = vadd.f32 %v700_v11, %v699_v43  ;;  %v713_v32 = vadd.f32 %v712_v13, %v711_v4  ;;  %v725_v34 = vadd.f32 %v724_v14, %v723_v9  ;;  %v822_v41 = vrot.slane %v821_v16, 2 }
 0x2bb   :  { %v1011_v56 = vsel %vm49_vm0, %v979_v15, 0.0  ;;  %v838_v9 = vrot.slane %v837_v48, 1  ;;  %v2011_v19 = vsel %vm1145_vm4, %v907_v0, %v1961_v33  ;;  %v844_v21 = vadd.f32 %v843_v30, %v842_v44  ;;  %v680_v44 = vpop.permute.xlu0 %679 }
 0x2bc   :  { %v1144_v61 = vsel %vm1143_vm3, %v1957_v24, %v701_v23  ;;  %v714_v37 = vrot.slane %v713_v32, 1  ;;  %v773_v17 = vpop.permute.xlu1 %772  ;;  %v726_v47 = vrot.slane %v725_v34, 2  ;;  %v1167_v24 = vsel %vm1145_vm4, %v811_v40, %v1955_v46 }
 0x2bd   :  { %v788_v26 = vmul.f32 %v1938_v54, %v773_v17  ;;  %v823_v63 = vadd.f32 %v822_v41, %v821_v16  ;;  %v1012_v5 = vrot.slane %v1011_v56, 4  ;;  %v817_v46 = vrot.slane %v816_v50, 1 }
 0x2be   :  { %v715_v36 = vadd.f32 %v714_v37, %v713_v32  ;;  %v727_v12 = vadd.f32 %v726_v47, %v725_v34  ;;  %v1006_v22 = vadd.f32 %v1005_v1, %v1004_v18  ;;  %v1002_v51 = vrot.slane %v2004_v10, 1 }
 0x2bf   :  { %v826_v52 = vsel %vm49_vm0, %v788_v26, 0.0  ;;  %v824_v13 = vrot.slane %v823_v63, 1  ;;  %v1013_v32 = vadd.f32 %v1012_v5, %v1011_v56  ;;  %v1033_v15 = vrot.slane %v1032_v53, 4 }
 0x2c0   :  { %v1146_v58 = vsel %vm1145_vm4, %v715_v36, %v1144_v61  ;;  %v827_v43 = vrot.slane %v826_v52, 4  ;;  %v728_v31 = vrot.slane %v727_v12, 1  ;;  %v818_v40 = vadd.f32 %v817_v46, %v816_v50 }
 0x2c1   :  { %v869_v4 = vpop.permute.xlu1 %868  ;;  %v1148_v16 = vsel %vm1147_vm5, %v722_v49, %v1146_v58  ;;  %v839_v37 = vadd.f32 %v838_v9, %v837_v48  ;;  %v825_v41 = vadd.f32 %v824_v13, %v823_v63  ;;  %v845_v29 = vrot.slane %v844_v21, 1 }
 0x2c2   :  { %v884_v7 = vmul.f32 %v1938_v54, %v869_v4  ;;  %v828_v11 = vadd.f32 %v827_v43, %v826_v52  ;;  %v1007_v62 = vrot.slane %v1006_v22, 2  ;;  %v729_v36 = vadd.f32 %v728_v31, %v727_v12 }
 0x2c3   :  { %v1014_v47 = vrot.slane %v1013_v32, 2  ;;  %v1034_v57 = vadd.f32 %v1033_v15, %v1032_v53  ;;  %v1168_v48 = vsel %vm1147_vm5, %v818_v40, %v1167_v24  ;;  %v693_v63 = vmul.f32 %v1949_v8, %v680_v44 }
 0x2c4   :  { %v922_v14 = vsel %vm49_vm0, %v884_v7, 0.0  ;;  %v829_v20 = vrot.slane %v828_v11, 2  ;;  %v1169_v1 = vsel %vm1149_vm6, %v825_v41, %v1168_v48  ;;  %v1008_v43 = vadd.f32 %v1007_v62, %v1006_v22 }
 0x2c5   :  { %v873_v23 = vpop.permute.xlu1 %872  ;;  %v923_v34 = vrot.slane %v922_v14, 4  ;;  %v1015_v5 = vadd.f32 %v1014_v47, %v1013_v32  ;;  %v846_v9 = vadd.f32 %v845_v29, %v844_v21  ;;  %v1035_v22 = vrot.slane %v1034_v57, 2 }
 0x2c6   :  { %v885_v38 = vmul.f32 %v1949_v8, %v873_v23  ;;  %v830_v61 = vadd.f32 %v829_v20, %v828_v11  ;;  %v2024_v11 = vsel %vm1149_vm6, %v729_v36, %v1148_v16  ;;  %v920_v20 = vrot.slane %v1970_v25, 1 }
 0x2c7   :  { %v924_v17 = vadd.f32 %v923_v34, %v922_v14  ;;  %v737_v23 = vsel %vm49_vm0, %v693_v63, 0.0  ;;  %v1009_v32 = vrot.slane %v1008_v43, 1  ;;  %v1022_v16 = vadd.f32 %v1021_v35, %v1983_v27 }
 0x2c8   :  { %v929_v33 = vsel %vm49_vm0, %v885_v38, 0.0  ;;  %v831_v26 = vrot.slane %v830_v61, 1  ;;  %v1016_v15 = vrot.slane %v1015_v5, 1  ;;  %v738_v41 = vrot.slane %v737_v23, 4 }
 0x2c9   :  { %v930_v45 = vrot.slane %v929_v33, 4  ;;  %v877_v18 = vpop.permute.xlu1 %876  ;;  %v925_v56 = vrot.slane %v924_v17, 2  ;;  %v921_v44 = vadd.f32 %v920_v20, %v1970_v25  ;;  %v1202_v27 = vsel %vm1143_vm3, %v1968_v59, %v1941_v2 }
 0x2ca   :  { %v886_v52 = vmul.f32 %v1977_v42, %v877_v18  ;;  %v832_v58 = vadd.f32 %v831_v26, %v830_v61  ;;  %v1186_v61 = vsel %vm1147_vm5, %v1963_v28, %v2011_v19  ;;  %v1036_v26 = vadd.f32 %v1035_v22, %v1034_v57 }
 0x2cb   :  { %v931_v50 = vadd.f32 %v930_v45, %v929_v33  ;;  %v926_v0 = vadd.f32 %v925_v56, %v924_v17  ;;  %v1045_v17 = vpop.permute.xlu0 %1044  ;;  %v1010_v35 = vadd.f32 %v1009_v32, %v1008_v43  ;;  %v1023_v47 = vrot.slane %v1022_v16, 1 }
 0x2cc   :  { %v936_v30 = vsel %vm49_vm0, %v886_v52, 0.0  ;;  %v1170_v12 = vsel %vm1151_vm8, %v832_v58, %v1169_v1  ;;  %v1017_v28 = vadd.f32 %v1016_v15, %v1015_v5  ;;  %v739_v56 = vadd.f32 %v738_v41, %v737_v23 }
 0x2cd   :  { %v932_v4 = vrot.slane %v931_v50, 2  ;;  %v937_v49 = vrot.slane %v936_v30, 4  ;;  %v1171_v46 = vsel %vm1153_vm7, %v839_v37, %v1170_v12  ;;  %v927_v24 = vrot.slane %v926_v0, 1 }
 0x2ce   :  { %v969_v7 = vpop.permute.xlu1 %968  ;;  %v1172_v31 = vsel %vm1155_vm9, %v846_v9, %v1171_v46  ;;  %v1003_v37 = vadd.f32 %v1002_v51, %v2004_v10  ;;  %v1187_v10 = vsel %vm1149_vm6, %v921_v44, %v1186_v61  ;;  %v1037_v57 = vrot.slane %v1036_v26, 1 }
 0x2cf   :  { %v933_v53 = vadd.f32 %v932_v4, %v931_v50  ;;  %v938_v13 = vadd.f32 %v937_v49, %v936_v30  ;;  %v981_v14 = vmul.f32 %v1949_v8, %v969_v7  ;;  %1173 = vrot.lane.b32.xlu1 %v1172_v31, %s1479_s0  ;;  %v928_v33 = vadd.f32 %v927_v24, %v926_v0  ;;  %v1057_v59 = vpop.permute.xlu0 %1056 }
 0x2d0   :  { %v1203_v51 = vsel %vm1145_vm4, %v1003_v37, %v1202_v27  ;;  %v1072_v58 = vmul.f32 %v1894_v60, %v1045_v17  ;;  %v1024_v49 = vadd.f32 %v1023_v47, %v1022_v16  ;;  %v740_v60 = vrot.slane %v739_v56, 2 }
 0x2d1   :  { %v934_v34 = vrot.slane %v933_v53, 1  ;;  %v939_v21 = vrot.slane %v938_v13, 2  ;;  %v1025_v38 = vsel %vm49_vm0, %v981_v14, 0.0  ;;  %v1188_v25 = vsel %vm1151_vm8, %v928_v33, %v1187_v10 }
 0x2d2   :  { %v1026_v40 = vrot.slane %v1025_v38, 4  ;;  %v1204_v1 = vsel %vm1147_vm5, %v1010_v35, %v1203_v51  ;;  %v1086_v5 = vsel %vm49_vm0, %v1072_v58, 0.0  ;;  %v1038_v24 = vadd.f32 %v1037_v57, %v1036_v26 }
 0x2d3   :  { %v940_v29 = vadd.f32 %v939_v21, %v938_v13  ;;  %v1041_v62 = vpop.permute.xlu1 %1040  ;;  %v935_v45 = vadd.f32 %v934_v34, %v933_v53  ;;  %v1205_v4 = vsel %vm1149_vm6, %v1017_v28, %v1204_v1  ;;  %v741_v22 = vadd.f32 %v740_v60, %v739_v56  ;;  %v1069_v31 = vpop.permute.xlu0 %1068 }
 0x2d4   :  { %v1027_v18 = vadd.f32 %v1026_v40, %v1025_v38  ;;  %v1071_v63 = vmul.f32 %v1887_v39, %v1041_v62  ;;  %v1206_v53 = vsel %vm1151_vm8, %v1024_v49, %v1205_v4  ;;  %v1087_v23 = vrot.slane %v1086_v5, 4 }
 0x2d5   :  { %v941_v36 = vrot.slane %v940_v29, 1  ;;  %v1189_v2 = vsel %vm1153_vm7, %v935_v45, %v1188_v25  ;;  %v1075_v34 = vmul.f32 %v1918_v3, %v1057_v59  ;;  %v1078_v61 = vmul.f32 %v1977_v42, %v1069_v31 }
 0x2d6   :  { %v1028_v19 = vrot.slane %v1027_v18, 2  ;;  %v1079_v39 = vsel %vm49_vm0, %v1071_v63, 0.0  ;;  %v742_v41 = vrot.slane %v741_v22, 1  ;;  %v1088_v17 = vadd.f32 %v1087_v23, %v1086_v5 }
 0x2d7   :  { %v942_v52 = vadd.f32 %v941_v36, %v940_v29  ;;  %v1080_v21 = vrot.slane %v1079_v39, 4  ;;  %v1107_v33 = vsel %vm49_vm0, %v1075_v34, 0.0 }
 0x2d8   :  { %v1029_v50 = vadd.f32 %v1028_v19, %v1027_v18  ;;  %v675_v48 = vpop.permute.xlu1 %674  ;;  %v1128_v18 = vsel %vm49_vm0, %v1078_v61, 0.0  ;;  %v743_v36 = vadd.f32 %v742_v41, %v741_v22  ;;  %v1108_v47 = vrot.slane %v1107_v33, 4 }
 0x2d9   :  { %v692_v0 = vmul.f32 %v1938_v54, %v675_v48  ;;  %v1190_v30 = vsel %vm1155_vm9, %v942_v52, %v1189_v2  ;;  %v1081_v29 = vadd.f32 %v1080_v21, %v1079_v39  ;;  %v1129_v56 = vrot.slane %v1128_v18, 4 }
 0x2da   :  { %v1030_v43 = vrot.slane %v1029_v50, 1  ;;  %1191 = vrot.lane.b32.xlu0 %v1190_v30, %s1480_s27  ;;  %v1109_v48 = vadd.f32 %v1108_v47, %v1107_v33 }
 0x2db   :  { %v730_v12 = vsel %vm49_vm0, %v692_v0, 0.0  ;;  %v1082_v19 = vrot.slane %v1081_v29, 2  ;;  %v1130_v0 = vadd.f32 %v1129_v56, %v1128_v18 }
 0x2dc   :  { %v1031_v7 = vadd.f32 %v1030_v43, %v1029_v50  ;;  %v731_v9 = vrot.slane %v730_v12, 4  ;;  %v1110_v49 = vrot.slane %v1109_v48, 2 }
 0x2dd   :  { %v1049_v46 = vpop.permute.xlu1 %1048  ;;  %v1083_v59 = vadd.f32 %v1082_v19, %v1081_v29  ;;  %v1131_v39 = vrot.slane %v1130_v0, 2 }
 0x2de   :  { %v732_v13 = vadd.f32 %v731_v9, %v730_v12  ;;  %v1073_v14 = vmul.f32 %v1924_v6, %v1049_v46  ;;  %v1207_v20 = vsel %vm1153_vm7, %v1031_v7, %v1206_v53 }
 0x2df   :  { %v1208_v32 = vsel %vm1155_vm9, %v1038_v24, %v1207_v20  ;;  %v1084_v12 = vrot.slane %v1083_v59, 1  ;;  %v1132_v21 = vadd.f32 %v1131_v39, %v1130_v0 }
 0x2e0   :  { %v733_v38 = vrot.slane %v732_v13, 2  ;;  %v1093_v16 = vsel %vm49_vm0, %v1073_v14, 0.0  ;;  %1209 = vrot.lane.b32.xlu1 %v1208_v32, %s1481_s4  ;;  %v1111_v14 = vadd.f32 %v1110_v49, %v1109_v48 }
 0x2e1   :  { %v1094_v15 = vrot.slane %v1093_v16, 4  ;;  %v1053_v40 = vpop.permute.xlu1 %1052  ;;  %v1085_v22 = vadd.f32 %v1084_v12, %v1083_v59 }
 0x2e2   :  { %v734_v6 = vadd.f32 %v733_v38, %v732_v13  ;;  %v1074_v37 = vmul.f32 %v1908_v55, %v1053_v40  ;;  %v1089_v55 = vrot.slane %v1088_v17, 2 }
 0x2e3   :  { %v1095_v44 = vadd.f32 %v1094_v15, %v1093_v16 }
 0x2e4   :  { %v735_v62 = vrot.slane %v734_v6, 1  ;;  %v1100_v3 = vsel %vm49_vm0, %v1074_v37, 0.0  ;;  %v1090_v63 = vadd.f32 %v1089_v55, %v1088_v17  ;;  %v1133_v17 = vrot.slane %v1132_v21, 1 }
 0x2e5   :  { %v1101_v26 = vrot.slane %v1100_v3, 4  ;;  %v1061_v45 = vpop.permute.xlu1 %1060  ;;  %v1096_v52 = vrot.slane %v1095_v44, 2 }
 0x2e6   :  { %v736_v27 = vadd.f32 %v735_v62, %v734_v6  ;;  %v1076_v35 = vmul.f32 %v1938_v54, %v1061_v45  ;;  %v1091_v9 = vrot.slane %v1090_v63, 1  ;;  %v1134_v18 = vadd.f32 %v1133_v17, %v1132_v21 }
 0x2e7   :  { %v1102_v28 = vadd.f32 %v1101_v26, %v1100_v3  ;;  %v1097_v30 = vadd.f32 %v1096_v52, %v1095_v44 }
 0x2e8   :  { %v1114_v10 = vsel %vm49_vm0, %v1076_v35, 0.0  ;;  %v1152_v51 = vsel %vm1151_vm8, %v736_v27, %v2024_v11  ;;  %v1092_v31 = vadd.f32 %v1091_v9, %v1090_v63 }
 0x2e9   :  { %v1115_v25 = vrot.slane %v1114_v10, 4  ;;  %v1154_v57 = vsel %vm1153_vm7, %v743_v36, %v1152_v51  ;;  %v1103_v58 = vrot.slane %v1102_v28, 2  ;;  %v1098_v46 = vrot.slane %v1097_v30, 1 }
 0x2ea   :  { %v685_v50 = vpop.permute.xlu1 %684  ;;  %v1220_v61 = vsel %vm1143_vm3, %v1092_v31, %v1085_v22 }
 0x2eb   :  { %v1116_v2 = vadd.f32 %v1115_v25, %v1114_v10  ;;  %v694_v54 = vmul.f32 %v1977_v42, %v685_v50  ;;  %v1104_v43 = vadd.f32 %v1103_v58, %v1102_v28  ;;  %v1099_v32 = vadd.f32 %v1098_v46, %v1097_v30 }
 0x2ed   :  { %v744_v1 = vsel %vm49_vm0, %v694_v54, 0.0  ;;  %v1117_v4 = vrot.slane %v1116_v2, 2  ;;  %v1105_v24 = vrot.slane %v1104_v43, 1  ;;  %v1221_v37 = vsel %vm1145_vm4, %v1099_v32, %v1220_v61 }
 0x2ee   :  { %v745_v11 = vrot.slane %v744_v1, 4 }
 0x2ef   :  { %v1065_v60 = vpop.permute.xlu1 %1064  ;;  %v1118_v42 = vadd.f32 %v1117_v4, %v1116_v2  ;;  %v1106_v38 = vadd.f32 %v1105_v24, %v1104_v43 }
 0x2f0   :  { %v746_v5 = vadd.f32 %v745_v11, %v744_v1  ;;  %v1077_v7 = vmul.f32 %v1949_v8, %v1065_v60  ;;  %v1112_v8 = vrot.slane %v1111_v14, 1 }
 0x2f1   :  { %v1119_v16 = vrot.slane %v1118_v42, 1  ;;  %v1222_v33 = vsel %vm1147_vm5, %v1106_v38, %v1221_v37 }
 0x2f2   :  { %v747_v53 = vrot.slane %v746_v5, 2  ;;  %v1121_v13 = vsel %vm49_vm0, %v1077_v7, 0.0  ;;  %v1113_v3 = vadd.f32 %v1112_v8, %v1111_v14 }
 0x2f3   :  { %v1122_v20 = vrot.slane %v1121_v13, 4  ;;  %v1120_v29 = vadd.f32 %v1119_v16, %v1118_v42 }
 0x2f4   :  { %v748_v23 = vadd.f32 %v747_v53, %v746_v5  ;;  %v1223_v45 = vsel %vm1149_vm6, %v1113_v3, %v1222_v33 }
 0x2f5   :  { %v1123_v34 = vadd.f32 %v1122_v20, %v1121_v13  ;;  %v1224_v27 = vsel %vm1151_vm8, %v1120_v29, %v1223_v45 }
 0x2f6   :  { %v749_v15 = vrot.slane %v748_v23, 1 }
 0x2f7   :  { %v1124_v40 = vrot.slane %v1123_v34, 2 }
 0x2f8   :  { %v750_v6 = vadd.f32 %v749_v15, %v748_v23 }
 0x2f9   :  { %v1125_v41 = vadd.f32 %v1124_v40, %v1123_v34 }
 0x2fa   :  { %v1156_v62 = vsel %vm1155_vm9, %v750_v6, %v1154_v57 }
 0x2fb   :  { %v1126_v44 = vrot.slane %v1125_v41, 1 }
 0x2fd   :  { %v1127_v26 = vadd.f32 %v1126_v44, %v1125_v41 }
 0x2ff   :  { %v1225_v35 = vsel %vm1153_vm7, %v1127_v26, %v1224_v27 }
 0x300   :  { %v1226_v36 = vsel %vm1155_vm9, %v1134_v18, %v1225_v35 }
 0x301   :  { %1234 = vst.msk [vmem:[#allocation2 + $0x8] sm:$0xff] %vm49_vm0, %v1226_v36 }
 0x341   :  { %v1174_v47 = vpop.permute.xlu1 %1173 }
 0x342   :  { %v1228_v55 = vsel %vm49_vm0, %v1156_v62, %v1174_v47 }
 0x34c   :  { %v1192_v28 = vpop.permute.xlu0 %1191 }
 0x34d   :  { %v1230_v19 = vsel %vm1229_vm10, %v1228_v55, %v1192_v28 }
 0x352   :  { %v1210_v10 = vpop.permute.xlu1 %1209 }
 0x353   :  { %v1232_v51 = vsel %vm1231_vm11, %v1230_v19, %v1210_v10 }
 0x354   :  { %1233 = vst [vmem:[#allocation2] sm:$0xff] %v1232_v51 }
 0x355   :  { %1459 = shalt.err (!%p1456_p4)
}
 0x356   :  { %s1460_s8 = scalar_lea.hbm %s2102_s5, 256 }
 0x357   :  { %p1461_p5 = scmp.ne.s32.totalorder %s2102_s5, %s1460_s8  ;;  %p1464_p6 = scmp.lt.u32.totalorder %s1460_s8, %s2102_s5 }
 0x359   :  { %p1466_p7 = pnand %p1464_p6, %p1461_p5 }
 0x35b   :  { %1469 = shalt.err (!%p1466_p7)
}
 0x35c   :  { %1244 = dma.vmem_to_hbm [thread:$0]  %s1242_s29, 256, %s2102_s5, [#allocation3]  }
 0x35d   :  { %1470 = dma.done.wait [#allocation3], 256  }
 0x35e   :  { %1471 = vsyncadd [#allocation3], 4294967040 }
 0x35f   :  { %1248 = vsyncpa [#allocation3], 1 }

</bundles_post_ra>
